<compile_context>
chip_gen: v7x
topology: tpu7x:2x2x1
jax: 0.10.0
libtpu: 0.0.40
codegen_flags: <defaults>
</compile_context>

<pallas_src>
import functools
import math

import jax
import jax.numpy as jnp
from jax.experimental import pallas as pl
from jax.experimental.pallas import tpu as pltpu

F32 = jnp.float32
BF16 = jnp.bfloat16
GROUPS = 32
EPS = 1e-5


def _vmem_limit_bytes():
    # Per-generation limit with headroom for Mosaic scratch / pipeline buffers:
    # v7x (64 MiB/TC) -> 48 MiB ; v5e/v6e (128 MiB) -> 112 MiB.
    cap = 128 * 1024 * 1024
    try:
        cap = int(getattr(pltpu.get_tpu_info(), "vmem_capacity_bytes", cap))
    except Exception:
        pass
    return int(min(cap - 16 * 1024 * 1024, 112 * 1024 * 1024))


VMEM_LIMIT = _vmem_limit_bytes()


def _compiler_params():
    return pltpu.CompilerParams(dimension_semantics=("parallel",),
                                vmem_limit_bytes=VMEM_LIMIT)


# ----------------------------------------------------------------------------
# In-kernel building blocks (operate on VMEM values / refs)
# ----------------------------------------------------------------------------

def _gn_silu(x, gamma, beta, p_mat, silu):
    """Two-pass GroupNorm(32) on an (L, C) f32 tile. p_mat is the host-precomputed (C, C)
    same-group projection already scaled by 1/(L*C_per_group), so mean and variance each
    take a single M=1 matmul. Optional fused SiLU. All math f32."""
    csum = jnp.sum(x, axis=0, keepdims=True)                                   # (1, C)
    mean_c = jnp.dot(csum, p_mat, preferred_element_type=F32)                  # (1, C)
    xc = x - mean_c
    csq = jnp.sum(xc * xc, axis=0, keepdims=True)                              # (1, C)
    var_c = jnp.dot(csq, p_mat, preferred_element_type=F32)                    # (1, C)
    y = xc * jax.lax.rsqrt(var_c + EPS) * gamma + beta
    if silu:
        y = y * jax.nn.sigmoid(y)
    return y


def _conv1d_same(h, w_ref, bias, K):
    """'same'-padded Conv1d on an (L, Cin) tile, h already in the MXU dtype.
    No im2col: each tap k is one aligned matmul h @ W_k (w_ref is a (K, Cin, Cout) VMEM ref);
    tap results are shifted on the f32 accumulator with pltpu.roll + an edge mask."""
    L = h.shape[0]
    pad = (K - 1) // 2
    acc = jnp.dot(h, w_ref[pad], preferred_element_type=F32)                   # centre tap
    if K > 1:
        rows = jax.lax.broadcasted_iota(jnp.int32, (L, 1), 0)
        for k in range(K):
            d = k - pad                                                        # source offset
            if d == 0:
                continue
            t = jnp.dot(h, w_ref[k], preferred_element_type=F32)               # (L, Cout) f32
            shifted = pltpu.roll(t, (-d) % L, axis=0)                          # shifted[i]=t[i+d]
            valid = (rows + d >= 0) & (rows + d < L)
            acc = acc + jnp.where(valid, shifted, 0.0)
    return acc + bias


# ----------------------------------------------------------------------------
# Fused kernels
# ----------------------------------------------------------------------------

def _resblock_kernel(x_ref, p_ref,
                     g1_ref, b1_ref, w1_ref, c1b_ref,
                     g2_ref, b2_ref, w2_ref, c2b_ref,
                     o_ref, *, K, mxu_dtype):
    x = x_ref[0].astype(F32)                                                   # (L, C)
    p_mat = p_ref[...]
    h = _gn_silu(x, g1_ref[...], b1_ref[...], p_mat, silu=True)
    h = _conv1d_same(h.astype(mxu_dtype), w1_ref, c1b_ref[...], K)             # cast once
    h = _gn_silu(h, g2_ref[...], b2_ref[...], p_mat, silu=True)
    # Dropout(p=0.1): eval-mode identity.
    h = _conv1d_same(h.astype(mxu_dtype), w2_ref, c2b_ref[...], K)
    o_ref[0] = (x + h).astype(o_ref.dtype)                                     # skip = Identity


def _attnblock_kernel(x_ref, p_ref, g_ref, b_ref,
                      wq_ref, bq_ref, wk_ref, bk_ref, wv_ref, bv_ref,
                      wproj_ref, bproj_ref, o_ref, *, H, mxu_dtype):
    x = x_ref[0].astype(F32)                                                   # (L, C)
    L, C = x.shape
    ch = C // H
    xn = _gn_silu(x, g_ref[...], b_ref[...], p_ref[...], silu=False).astype(mxu_dtype)
    # 1x1 QKV conv as three lane-dense matmuls; per-head q/k/v live at offsets hi*ch.
    # QKVAttentionLegacy's 1/sqrt(ch) scale is folded into wq/bq at init (zero runtime cost).
    q_all = (jnp.dot(xn, wq_ref[...], preferred_element_type=F32) + bq_ref[...]).astype(mxu_dtype)
    k_all = (jnp.dot(xn, wk_ref[...], preferred_element_type=F32) + bk_ref[...]).astype(mxu_dtype)
    v_all = (jnp.dot(xn, wv_ref[...], preferred_element_type=F32) + bv_ref[...]).astype(mxu_dtype)
    # Per-head attention accumulated straight into the projection output (no head concat).
    proj = jnp.zeros((L, C), F32)
    for hi in range(H):                                                        # static, small H
        lo = hi * ch
        q = q_all[:, lo:lo + ch]
        k = k_all[:, lo:lo + ch]
        v = v_all[:, lo:lo + ch]
        s = jax.lax.dot_general(q, k, (((1,), (1,)), ((), ())),
                                preferred_element_type=F32)                    # (L, L) f32
        s = s - jnp.max(s, axis=-1, keepdims=True)
        e = jnp.exp(s)
        p_attn = (e * pl.reciprocal(jnp.sum(e, axis=-1, keepdims=True),
                                    approx=True)).astype(mxu_dtype)
        head = jnp.dot(p_attn, v, preferred_element_type=F32).astype(mxu_dtype)  # (L, ch)
        proj = proj + jnp.dot(head, wproj_ref[hi], preferred_element_type=F32)
    o_ref[0] = (x + proj + bproj_ref[...]).astype(o_ref.dtype)


def _interp_conv_kernel(mtx_ref, x_ref, w_ref, b_ref, o_ref, *, K, mxu_dtype):
    # F.interpolate(mode='linear') as a bf16 interp-matrix matmul; its output stays in VMEM
    # and feeds the fused up-conv directly.
    # TODO(synk): at production Lo, replace the dense (Lo, Li) matrix by a banded / 2-tap lerp
    # (and tile Lo on the grid) to avoid the O(Lo*Li*C) FLOPs + VMEM slab.
    x = x_ref[0].astype(mxu_dtype)                                             # (Li, Cin)
    xi = jnp.dot(mtx_ref[...], x, preferred_element_type=F32)                  # (Lo, Cin) f32
    o_ref[0] = _conv1d_same(xi.astype(mxu_dtype), w_ref, b_ref[...], K).astype(o_ref.dtype)


def _final_mse_kernel(x_ref, w_ref, b_ref, t_ref, pred_ref, sse_ref, *, K):
    pred = _conv1d_same(x_ref[0], w_ref, b_ref[...], K)                        # f32, lane-dense
    pred_ref[0] = pred
    d = pred - t_ref[0]                                                        # target zero-padded
    # Per-batch partial SSE (lane-dense 128-wide block); reduced in the wrapper so the grid
    # stays "parallel" (v7x dual-TC) instead of a serial VMEM accumulator.
    sse_ref[...] = jnp.full(sse_ref.shape, jnp.sum(d * d), dtype=F32)


# ----------------------------------------------------------------------------
# Wrappers (one pallas_call per fused block)
# ----------------------------------------------------------------------------

def _full_spec(shape):
    # Constant-index (weight/GN-matrix) specs.  On VMEM-tight chips these could additionally
    # use pipeline_mode=pl.Buffered(1) to drop their second pipeline buffer.
    return pl.BlockSpec(shape, lambda b: (0,) * len(shape))


def res_block(x, p, p_mat, *, K, mxu_dtype, out_dtype):
    B, L, C = x.shape
    return pl.pallas_call(
        functools.partial(_resblock_kernel, K=K, mxu_dtype=mxu_dtype),
        out_shape=jax.ShapeDtypeStruct((B, L, C), out_dtype),
        grid=(B,),
        in_specs=[pl.BlockSpec((1, L, C), lambda b: (b, 0, 0)),
                  _full_spec((C, C)),
                  _full_spec((1, C)), _full_spec((1, C)),
                  _full_spec((K, C, C)), _full_spec((1, C)),
                  _full_spec((1, C)), _full_spec((1, C)),
                  _full_spec((K, C, C)), _full_spec((1, C))],
        out_specs=pl.BlockSpec((1, L, C), lambda b: (b, 0, 0)),
        compiler_params=_compiler_params(),
    )(x, p_mat,
      p["gn1"]["g"], p["gn1"]["b"], p["c1"]["w"], p["c1"]["b"],
      p["gn2"]["g"], p["gn2"]["b"], p["c2"]["w"], p["c2"]["b"])


def attention_block(x, p, p_mat, *, num_heads, mxu_dtype, out_dtype):
    B, L, C = x.shape
    ch = C // num_heads
    return pl.pallas_call(
        functools.partial(_attnblock_kernel, H=num_heads, mxu_dtype=mxu_dtype),
        out_shape=jax.ShapeDtypeStruct((B, L, C), out_dtype),
        grid=(B,),
        in_specs=[pl.BlockSpec((1, L, C), lambda b: (b, 0, 0)),
                  _full_spec((C, C)),
                  _full_spec((1, C)), _full_spec((1, C)),
                  _full_spec((C, C)), _full_spec((1, C)),
                  _full_spec((C, C)), _full_spec((1, C)),
                  _full_spec((C, C)), _full_spec((1, C)),
                  _full_spec((num_heads, ch, C)), _full_spec((1, C))],
        out_specs=pl.BlockSpec((1, L, C), lambda b: (b, 0, 0)),
        compiler_params=_compiler_params(),
    )(x, p_mat, p["n"]["g"], p["n"]["b"],
      p["wq"], p["bq"], p["wk"], p["bk"], p["wv"], p["bv"],
      p["wproj"], p["bproj"])


def _interp_matrix(li, lo):
    # F.interpolate(mode='linear', align_corners=False) as a (Lo, Li) matrix (host-side).
    i = jnp.arange(lo, dtype=F32)
    src = jnp.clip((i + 0.5) * (li / lo) - 0.5, 0.0, li - 1)
    i0 = jnp.floor(src).astype(jnp.int32)
    i1 = jnp.minimum(i0 + 1, li - 1)
    w1 = src - i0.astype(F32)
    rows = jnp.arange(lo)
    m = jnp.zeros((lo, li), F32)
    m = m.at[rows, i0].add(1.0 - w1)
    m = m.at[rows, i1].add(w1)
    return m


def interp_up_conv(x, lo, p, *, K, mxu_dtype, out_dtype):
    """Fused F.interpolate(mode='linear') + 'same' Conv1d. x: (B, Li, Cin) -> (B, Lo, Cout)."""
    B, li, cin = x.shape
    cout = p["b"].shape[-1]
    mtx = _interp_matrix(li, lo).astype(mxu_dtype)          # bf16 inside the autocast region
    return pl.pallas_call(
        functools.partial(_interp_conv_kernel, K=K, mxu_dtype=mxu_dtype),
        out_shape=jax.ShapeDtypeStruct((B, lo, cout), out_dtype),
        grid=(B,),
        in_specs=[_full_spec((lo, li)),
                  pl.BlockSpec((1, li, cin), lambda b: (b, 0, 0)),
                  _full_spec((K, cin, cout)), _full_spec((1, cout))],
        out_specs=pl.BlockSpec((1, lo, cout), lambda b: (b, 0, 0)),
        compiler_params=_compiler_params(),
    )(mtx, x, p["w"], p["b"])


def final_conv_and_mse(x, p, target_pad_cl, out_dim, *, K):
    """Fused final Conv1d (f32, lane-dense padded Cout) + per-batch MSE partials.
    x: (B, L, Cin), target_pad_cl: (B, L, Cout_pad) with zero padding beyond out_dim."""
    B, L, cin = x.shape
    cout_pad = p["b"].shape[-1]
    inv_n = 1.0 / float(B * L * out_dim)
    pred_pad, sse = pl.pallas_call(
        functools.partial(_final_mse_kernel, K=K),
        out_shape=(jax.ShapeDtypeStruct((B, L, cout_pad), F32),
                   jax.ShapeDtypeStruct((B, 1, 128), F32)),
        grid=(B,),
        in_specs=[pl.BlockSpec((1, L, cin), lambda b: (b, 0, 0)),
                  _full_spec((K, cin, cout_pad)), _full_spec((1, cout_pad)),
                  pl.BlockSpec((1, L, cout_pad), lambda b: (b, 0, 0))],
        out_specs=(pl.BlockSpec((1, L, cout_pad), lambda b: (b, 0, 0)),
                   pl.BlockSpec((1, 1, 128), lambda b: (b, 0, 0))),
        compiler_params=_compiler_params(),
    )(x, p["w"], p["b"], target_pad_cl)
    loss = jnp.sum(sse[:, 0, 0]) * inv_n
    return pred_pad[:, :, :out_dim], loss


# ----------------------------------------------------------------------------
# Model glue
# ----------------------------------------------------------------------------

def multi_group_embedding(codes, tables):
    # codes: (B, S, G) int32 ; tables[g]: (num_tokens, dim // G)
    # TODO(synk): embedding gather left in plain JAX (data-dependent lookup).
    hs = [jnp.take(tables[g], codes[:, :, g], axis=0) for g in range(len(tables))]
    return jnp.concatenate(hs, axis=-1)                                        # (B, S, dim)


def _gn_proj_matrix(C, L):
    # (C, C) same-group indicator scaled by 1/(L * C_per_group).
    cg = C // GROUPS
    gid = jnp.arange(C, dtype=jnp.int32) // cg
    m = (gid[:, None] == gid[None, :]).astype(F32)
    return m / float(L * cg)


def apply_seq(h, blocks, num_heads, mxu_dtype, out_dtype):
    _, L, C = h.shape
    p_mat = _gn_proj_matrix(C, L)
    for blk in blocks:
        if blk[0] == "rb":
            _, K, p = blk
            h = res_block(h, p, p_mat, K=K, mxu_dtype=mxu_dtype, out_dtype=out_dtype)
        else:
            _, p = blk
            h = attention_block(h, p, p_mat, num_heads=num_heads,
                                mxu_dtype=mxu_dtype, out_dtype=out_dtype)
    return h


def code2mel_forward(params, codes, target, num_heads):
    """codes: (B, S, num_groups) int32 ; target: (B, out_dim, T) (PyTorch layout).
       Returns (mse_loss, pred) with pred in PyTorch layout (B, out_dim, T)."""
    # torch.autocast(bf16) region: bf16 MXU operands + bf16 inter-block activations,
    # f32 accumulation / GroupNorm / softmax.
    h = multi_group_embedding(codes, params["emb"])                            # (B, S, base_dim) f32
    h = apply_seq(h, params["base"], num_heads, BF16, out_dtype=BF16)
    h = interp_up_conv(h, 2 * h.shape[1], params["l2_up"], K=5,
                       mxu_dtype=BF16, out_dtype=BF16)
    h = apply_seq(h, params["l2"], num_heads, BF16, out_dtype=BF16)
    h = interp_up_conv(h, target.shape[-1], params["l3_up"], K=5,
                       mxu_dtype=BF16, out_dtype=F32)
    # autocast ends: l3 blocks and final conv run in f32 (matches `h.float()`).
    h = apply_seq(h, params["l3"], num_heads, F32, out_dtype=F32)

    out_dim = target.shape[1]
    cout_pad = params["final"]["b"].shape[-1]
    target_cl = jnp.transpose(target, (0, 2, 1))                               # (B, T, out_dim)
    target_pad = jnp.pad(target_cl, ((0, 0), (0, 0), (0, cout_pad - out_dim)))
    pred_cl, loss = final_conv_and_mse(h, params["final"], target_pad, out_dim, K=3)
    return loss, jnp.transpose(pred_cl, (0, 2, 1))                             # (B, out_dim, T)


# ----------------------------------------------------------------------------
# Deterministic parameter initialization (shapes follow the module __init__)
# ----------------------------------------------------------------------------

def init_code2mel_params(key, *, out_dim, base_dim, num_tokens, num_groups,
                         chan_step, num_heads):
    l2dim = base_dim - chan_step
    l3dim = l2dim - chan_step
    keys = iter(jax.random.split(key, 512))

    def rnd(shape, scale=0.02):
        return jax.random.normal(next(keys), shape, F32) * scale

    def conv(cin, cout, k, dtype, pad_cout_to=None):
        # Conv1d weights stored per-tap as (K, Cin, Cout) in the level's MXU dtype.
        w, b = rnd((k, cin, cout)), rnd((1, cout), 0.01)
        if pad_cout_to is not None and pad_cout_to > cout:
            w = jnp.pad(w, ((0, 0), (0, 0), (0, pad_cout_to - cout)))
            b = jnp.pad(b, ((0, 0), (0, pad_cout_to - cout)))
        return {"w": w.astype(dtype), "b": b}                                  # bias stays f32

    def gn(c):
        return {"g": jnp.ones((1, c), F32), "b": jnp.zeros((1, c), F32)}

    def rb(c, k, dtype):
        # NOTE: 2nd conv is zero_module() in torch; small random weights keep compute non-trivial.
        return ("rb", k, {"gn1": gn(c), "c1": conv(c, c, k, dtype),
                          "gn2": gn(c), "c2": conv(c, c, k, dtype)})

    def attn(c, dtype):
        ch = c // num_heads
        scale = 1.0 / math.sqrt(ch)                    # QKVAttentionLegacy scale, folded into Q
        return ("attn", {
            "n": gn(c),
            "wq": (rnd((c, c)) * scale).astype(dtype), "bq": rnd((1, c), 0.01) * scale,
            "wk": rnd((c, c)).astype(dtype),           "bk": rnd((1, c), 0.01),
            "wv": rnd((c, c)).astype(dtype),           "bv": rnd((1, c), 0.01),
            # proj_out is zero_module() in torch; small random here (documented). Rows pre-split
            # per head so the kernel accumulates head @ Wproj[h] without a head concat.
            "wproj": rnd((num_heads, ch, c)).astype(dtype), "bproj": rnd((1, c), 0.01),
        })

    emb_dim = base_dim // num_groups
    cout_pad = ((out_dim + 127) // 128) * 128          # lane-dense final conv output
    return {
        "emb": [rnd((num_tokens, emb_dim)) for _ in range(num_groups)],
        "base": [rb(base_dim, 3, BF16), attn(base_dim, BF16), rb(base_dim, 3, BF16)],
        "l2_up": conv(base_dim, l2dim, 5, BF16),
        "l2": [rb(l2dim, 5, BF16), attn(l2dim, BF16), rb(l2dim, 5, BF16),
               attn(l2dim, BF16), rb(l2dim, 3, BF16), rb(l2dim, 3, BF16)],
        "l3_up": conv(l2dim, l3dim, 5, BF16),
        "l3": [rb(l3dim, 5, F32), attn(l3dim, F32), rb(l3dim, 5, F32), rb(l3dim, 3, F32)],
        "final": conv(l3dim, out_dim, 3, F32, pad_cout_to=cout_pad),
    }


# ----------------------------------------------------------------------------
# Demo
# ----------------------------------------------------------------------------

if __name__ == "__main__":
    key = jax.random.PRNGKey(0)
    # Scaled-down Code2Mel config (structure preserved; head dims 64/48/32, GN 32 groups).
    B, S, T = 2, 8, 32
    out_dim, base_dim, num_tokens, num_groups, chan_step = 64, 256, 16, 4, 64
    num_heads = base_dim // 64

    kp, kc, kt = jax.random.split(key, 3)
    params = init_code2mel_params(kp, out_dim=out_dim, base_dim=base_dim,
                                  num_tokens=num_tokens, num_groups=num_groups,
                                  chan_step=chan_step, num_heads=num_heads)
    codes = jax.random.randint(kc, (B, S, num_groups), 0, num_tokens, dtype=jnp.int32)
    target = jax.random.normal(kt, (B, out_dim, T), F32)   # PyTorch (B, C, T) layout

    loss, pred = code2mel_forward(params, codes, target, num_heads)
    jax.block_until_ready((loss, pred))

    assert pred.shape == (B, out_dim, T), pred.shape
    assert pred.dtype == jnp.float32
    assert bool(jnp.isfinite(loss)), loss
    print("KERNEL_OK")
</pallas_src>

<mosaic_0001>
module attributes {stable_mosaic.version = 11 : i64} {
  func.func @_resblock_kernel(%arg0: i32, %arg1: memref<1x8x256xf32, #tpu.memory_space<vmem>>, %arg2: memref<256x256xf32, #tpu.memory_space<vmem>>, %arg3: memref<1x256xf32, #tpu.memory_space<vmem>>, %arg4: memref<1x256xf32, #tpu.memory_space<vmem>>, %arg5: memref<3x256x256xbf16, #tpu.memory_space<vmem>>, %arg6: memref<1x256xf32, #tpu.memory_space<vmem>>, %arg7: memref<1x256xf32, #tpu.memory_space<vmem>>, %arg8: memref<1x256xf32, #tpu.memory_space<vmem>>, %arg9: memref<3x256x256xbf16, #tpu.memory_space<vmem>>, %arg10: memref<1x256xf32, #tpu.memory_space<vmem>>, %arg11: memref<1x8x256xbf16, #tpu.memory_space<vmem>>) attributes {dimension_semantics = [#tpu.dimension_semantics<parallel>], iteration_bounds = array<i64: 2>, scalar_prefetch = 0 : i64, scratch_operands = 0 : i64, tpu.core_type = #tpu.core_type<tc>, window_params = [{transform_indices = @transform_0, window_bounds = array<i64: 1, 8, 256>}, {pipeline_mode = #tpu.pipeline_mode<synchronous>, transform_indices = @transform_1, window_bounds = array<i64: 256, 256>}, {pipeline_mode = #tpu.pipeline_mode<synchronous>, transform_indices = @transform_2, window_bounds = array<i64: 1, 256>}, {pipeline_mode = #tpu.pipeline_mode<synchronous>, transform_indices = @transform_3, window_bounds = array<i64: 1, 256>}, {pipeline_mode = #tpu.pipeline_mode<synchronous>, transform_indices = @transform_4, window_bounds = array<i64: 3, 256, 256>}, {pipeline_mode = #tpu.pipeline_mode<synchronous>, transform_indices = @transform_5, window_bounds = array<i64: 1, 256>}, {pipeline_mode = #tpu.pipeline_mode<synchronous>, transform_indices = @transform_6, window_bounds = array<i64: 1, 256>}, {pipeline_mode = #tpu.pipeline_mode<synchronous>, transform_indices = @transform_7, window_bounds = array<i64: 1, 256>}, {pipeline_mode = #tpu.pipeline_mode<synchronous>, transform_indices = @transform_8, window_bounds = array<i64: 3, 256, 256>}, {pipeline_mode = #tpu.pipeline_mode<synchronous>, transform_indices = @transform_9, window_bounds = array<i64: 1, 256>}, {transform_indices = @transform_10, window_bounds = array<i64: 1, 8, 256>}]} {
    %c0 = arith.constant 0 : index
    %c0_0 = arith.constant 0 : index
    %c0_1 = arith.constant 0 : index
    %0 = vector.load %arg1[%c0, %c0_0, %c0_1] : memref<1x8x256xf32, #tpu.memory_space<vmem>>, vector<1x8x256xf32>
    %1 = vector.shape_cast %0 : vector<1x8x256xf32> to vector<8x256xf32>
    %c0_2 = arith.constant 0 : index
    %c0_3 = arith.constant 0 : index
    %2 = vector.load %arg2[%c0_2, %c0_3] : memref<256x256xf32, #tpu.memory_space<vmem>>, vector<256x256xf32>
    %c0_4 = arith.constant 0 : index
    %c0_5 = arith.constant 0 : index
    %3 = vector.load %arg3[%c0_4, %c0_5] : memref<1x256xf32, #tpu.memory_space<vmem>>, vector<1x256xf32>
    %c0_6 = arith.constant 0 : index
    %c0_7 = arith.constant 0 : index
    %4 = vector.load %arg4[%c0_6, %c0_7] : memref<1x256xf32, #tpu.memory_space<vmem>>, vector<1x256xf32>
    %cst = arith.constant dense<0.000000e+00> : vector<256xf32>
    %5 = vector.multi_reduction <add>, %1, %cst [0] : vector<8x256xf32> to vector<256xf32>
    %6 = vector.shape_cast %5 : vector<256xf32> to vector<1x256xf32>
    %cst_8 = arith.constant dense<0.000000e+00> : vector<1x256xf32>
    %7 = tpu.matmul %6, %2, %cst_8 {dimension_numbers = #tpu.dot_dimension_numbers<[1], [0], [0], [1], [0, 0, 1, 1], [], []>} : vector<1x256xf32>, vector<256x256xf32>, vector<1x256xf32> -> vector<1x256xf32>
    %8 = vector.broadcast %7 : vector<1x256xf32> to vector<8x256xf32>
    %9 = arith.subf %1, %8 : vector<8x256xf32>
    %10 = arith.mulf %9, %9 : vector<8x256xf32>
    %cst_9 = arith.constant dense<0.000000e+00> : vector<256xf32>
    %11 = vector.multi_reduction <add>, %10, %cst_9 [0] : vector<8x256xf32> to vector<256xf32>
    %12 = vector.shape_cast %11 : vector<256xf32> to vector<1x256xf32>
    %cst_10 = arith.constant dense<0.000000e+00> : vector<1x256xf32>
    %13 = tpu.matmul %12, %2, %cst_10 {dimension_numbers = #tpu.dot_dimension_numbers<[1], [0], [0], [1], [0, 0, 1, 1], [], []>} : vector<1x256xf32>, vector<256x256xf32>, vector<1x256xf32> -> vector<1x256xf32>
    %cst_11 = arith.constant 9.99999974E-6 : f32
    %14 = vector.broadcast %cst_11 : f32 to vector<1x256xf32>
    %15 = arith.addf %13, %14 : vector<1x256xf32>
    %16 = math.rsqrt %15 : vector<1x256xf32>
    %17 = vector.broadcast %16 : vector<1x256xf32> to vector<8x256xf32>
    %18 = arith.mulf %9, %17 : vector<8x256xf32>
    %19 = vector.broadcast %3 : vector<1x256xf32> to vector<8x256xf32>
    %20 = arith.mulf %18, %19 : vector<8x256xf32>
    %21 = vector.broadcast %4 : vector<1x256xf32> to vector<8x256xf32>
    %22 = arith.addf %20, %21 : vector<8x256xf32>
    %23 = arith.negf %22 : vector<8x256xf32>
    %24 = math.exp %23 : vector<8x256xf32>
    %cst_12 = arith.constant 1.000000e+00 : f32
    %25 = vector.broadcast %cst_12 : f32 to vector<8x256xf32>
    %26 = arith.addf %25, %24 : vector<8x256xf32>
    %27 = arith.divf %25, %26 : vector<8x256xf32>
    %28 = arith.mulf %22, %27 : vector<8x256xf32>
    %29 = arith.truncf %28 : vector<8x256xf32> to vector<8x256xbf16>
    %c0_13 = arith.constant 0 : index
    %c0_14 = arith.constant 0 : index
    %30 = vector.load %arg6[%c0_13, %c0_14] : memref<1x256xf32, #tpu.memory_space<vmem>>, vector<1x256xf32>
    %c1 = arith.constant 1 : index
    %c0_15 = arith.constant 0 : index
    %c0_16 = arith.constant 0 : index
    %31 = vector.load %arg5[%c1, %c0_15, %c0_16] : memref<3x256x256xbf16, #tpu.memory_space<vmem>>, vector<1x256x256xbf16>
    %32 = vector.shape_cast %31 : vector<1x256x256xbf16> to vector<256x256xbf16>
    %cst_17 = arith.constant dense<0.000000e+00> : vector<8x256xf32>
    %33 = tpu.matmul %29, %32, %cst_17 {dimension_numbers = #tpu.dot_dimension_numbers<[1], [0], [0], [1], [0, 0, 1, 1], [], []>} : vector<8x256xbf16>, vector<256x256xbf16>, vector<8x256xf32> -> vector<8x256xf32>
    %34 = tpu.iota {dimensions = array<i32: 0>} : vector<8x1xi32>
    %c0_18 = arith.constant 0 : index
    %c0_19 = arith.constant 0 : index
    %c0_20 = arith.constant 0 : index
    %35 = vector.load %arg5[%c0_18, %c0_19, %c0_20] : memref<3x256x256xbf16, #tpu.memory_space<vmem>>, vector<1x256x256xbf16>
    %36 = vector.shape_cast %35 : vector<1x256x256xbf16> to vector<256x256xbf16>
    %cst_21 = arith.constant dense<0.000000e+00> : vector<8x256xf32>
    %37 = tpu.matmul %29, %36, %cst_21 {dimension_numbers = #tpu.dot_dimension_numbers<[1], [0], [0], [1], [0, 0, 1, 1], [], []>} : vector<8x256xbf16>, vector<256x256xbf16>, vector<8x256xf32> -> vector<8x256xf32>
    %c1_i32 = arith.constant 1 : i32
    %38 = tpu.dynamic_rotate %37 by %c1_i32 dim 0 : vector<8x256xf32>, i32 -> vector<8x256xf32>
    %c-1_i32 = arith.constant -1 : i32
    %39 = vector.broadcast %c-1_i32 : i32 to vector<8x1xi32>
    %40 = arith.addi %34, %39 : vector<8x1xi32>
    %c0_i32 = arith.constant 0 : i32
    %41 = vector.broadcast %c0_i32 : i32 to vector<8x1xi32>
    %42 = arith.cmpi sge, %40, %41 : vector<8x1xi32>
    %c-1_i32_22 = arith.constant -1 : i32
    %43 = vector.broadcast %c-1_i32_22 : i32 to vector<8x1xi32>
    %44 = arith.addi %34, %43 : vector<8x1xi32>
    %c8_i32 = arith.constant 8 : i32
    %45 = vector.broadcast %c8_i32 : i32 to vector<8x1xi32>
    %46 = arith.cmpi slt, %44, %45 : vector<8x1xi32>
    %47 = arith.andi %42, %46 : vector<8x1xi1>
    %cst_23 = arith.constant 0.000000e+00 : f32
    %48 = vector.shape_cast %47 : vector<8x1xi1> to vector<8x1xi1>
    %49 = vector.broadcast %48 : vector<8x1xi1> to vector<8x256xi1>
    %50 = vector.broadcast %cst_23 : f32 to vector<8x256xf32>
    %51 = arith.select %49, %38, %50 : vector<8x256xi1>, vector<8x256xf32>
    %52 = arith.addf %33, %51 : vector<8x256xf32>
    %c2 = arith.constant 2 : index
    %c0_24 = arith.constant 0 : index
    %c0_25 = arith.constant 0 : index
    %53 = vector.load %arg5[%c2, %c0_24, %c0_25] : memref<3x256x256xbf16, #tpu.memory_space<vmem>>, vector<1x256x256xbf16>
    %54 = vector.shape_cast %53 : vector<1x256x256xbf16> to vector<256x256xbf16>
    %cst_26 = arith.constant dense<0.000000e+00> : vector<8x256xf32>
    %55 = tpu.matmul %29, %54, %cst_26 {dimension_numbers = #tpu.dot_dimension_numbers<[1], [0], [0], [1], [0, 0, 1, 1], [], []>} : vector<8x256xbf16>, vector<256x256xbf16>, vector<8x256xf32> -> vector<8x256xf32>
    %c7_i32 = arith.constant 7 : i32
    %56 = tpu.dynamic_rotate %55 by %c7_i32 dim 0 : vector<8x256xf32>, i32 -> vector<8x256xf32>
    %c1_i32_27 = arith.constant 1 : i32
    %57 = vector.broadcast %c1_i32_27 : i32 to vector<8x1xi32>
    %58 = arith.addi %34, %57 : vector<8x1xi32>
    %c0_i32_28 = arith.constant 0 : i32
    %59 = vector.broadcast %c0_i32_28 : i32 to vector<8x1xi32>
    %60 = arith.cmpi sge, %58, %59 : vector<8x1xi32>
    %c1_i32_29 = arith.constant 1 : i32
    %61 = vector.broadcast %c1_i32_29 : i32 to vector<8x1xi32>
    %62 = arith.addi %34, %61 : vector<8x1xi32>
    %c8_i32_30 = arith.constant 8 : i32
    %63 = vector.broadcast %c8_i32_30 : i32 to vector<8x1xi32>
    %64 = arith.cmpi slt, %62, %63 : vector<8x1xi32>
    %65 = arith.andi %60, %64 : vector<8x1xi1>
    %cst_31 = arith.constant 0.000000e+00 : f32
    %66 = vector.shape_cast %65 : vector<8x1xi1> to vector<8x1xi1>
    %67 = vector.broadcast %66 : vector<8x1xi1> to vector<8x256xi1>
    %68 = vector.broadcast %cst_31 : f32 to vector<8x256xf32>
    %69 = arith.select %67, %56, %68 : vector<8x256xi1>, vector<8x256xf32>
    %70 = arith.addf %52, %69 : vector<8x256xf32>
    %71 = vector.broadcast %30 : vector<1x256xf32> to vector<8x256xf32>
    %72 = arith.addf %70, %71 : vector<8x256xf32>
    %c0_32 = arith.constant 0 : index
    %c0_33 = arith.constant 0 : index
    %73 = vector.load %arg7[%c0_32, %c0_33] : memref<1x256xf32, #tpu.memory_space<vmem>>, vector<1x256xf32>
    %c0_34 = arith.constant 0 : index
    %c0_35 = arith.constant 0 : index
    %74 = vector.load %arg8[%c0_34, %c0_35] : memref<1x256xf32, #tpu.memory_space<vmem>>, vector<1x256xf32>
    %cst_36 = arith.constant dense<0.000000e+00> : vector<256xf32>
    %75 = vector.multi_reduction <add>, %72, %cst_36 [0] : vector<8x256xf32> to vector<256xf32>
    %76 = vector.shape_cast %75 : vector<256xf32> to vector<1x256xf32>
    %cst_37 = arith.constant dense<0.000000e+00> : vector<1x256xf32>
    %77 = tpu.matmul %76, %2, %cst_37 {dimension_numbers = #tpu.dot_dimension_numbers<[1], [0], [0], [1], [0, 0, 1, 1], [], []>} : vector<1x256xf32>, vector<256x256xf32>, vector<1x256xf32> -> vector<1x256xf32>
    %78 = vector.broadcast %77 : vector<1x256xf32> to vector<8x256xf32>
    %79 = arith.subf %72, %78 : vector<8x256xf32>
    %80 = arith.mulf %79, %79 : vector<8x256xf32>
    %cst_38 = arith.constant dense<0.000000e+00> : vector<256xf32>
    %81 = vector.multi_reduction <add>, %80, %cst_38 [0] : vector<8x256xf32> to vector<256xf32>
    %82 = vector.shape_cast %81 : vector<256xf32> to vector<1x256xf32>
    %cst_39 = arith.constant dense<0.000000e+00> : vector<1x256xf32>
    %83 = tpu.matmul %82, %2, %cst_39 {dimension_numbers = #tpu.dot_dimension_numbers<[1], [0], [0], [1], [0, 0, 1, 1], [], []>} : vector<1x256xf32>, vector<256x256xf32>, vector<1x256xf32> -> vector<1x256xf32>
    %cst_40 = arith.constant 9.99999974E-6 : f32
    %84 = vector.broadcast %cst_40 : f32 to vector<1x256xf32>
    %85 = arith.addf %83, %84 : vector<1x256xf32>
    %86 = math.rsqrt %85 : vector<1x256xf32>
    %87 = vector.broadcast %86 : vector<1x256xf32> to vector<8x256xf32>
    %88 = arith.mulf %79, %87 : vector<8x256xf32>
    %89 = vector.broadcast %73 : vector<1x256xf32> to vector<8x256xf32>
    %90 = arith.mulf %88, %89 : vector<8x256xf32>
    %91 = vector.broadcast %74 : vector<1x256xf32> to vector<8x256xf32>
    %92 = arith.addf %90, %91 : vector<8x256xf32>
    %93 = arith.negf %92 : vector<8x256xf32>
    %94 = math.exp %93 : vector<8x256xf32>
    %cst_41 = arith.constant 1.000000e+00 : f32
    %95 = vector.broadcast %cst_41 : f32 to vector<8x256xf32>
    %96 = arith.addf %95, %94 : vector<8x256xf32>
    %97 = arith.divf %95, %96 : vector<8x256xf32>
    %98 = arith.mulf %92, %97 : vector<8x256xf32>
    %99 = arith.truncf %98 : vector<8x256xf32> to vector<8x256xbf16>
    %c0_42 = arith.constant 0 : index
    %c0_43 = arith.constant 0 : index
    %100 = vector.load %arg10[%c0_42, %c0_43] : memref<1x256xf32, #tpu.memory_space<vmem>>, vector<1x256xf32>
    %c1_44 = arith.constant 1 : index
    %c0_45 = arith.constant 0 : index
    %c0_46 = arith.constant 0 : index
    %101 = vector.load %arg9[%c1_44, %c0_45, %c0_46] : memref<3x256x256xbf16, #tpu.memory_space<vmem>>, vector<1x256x256xbf16>
    %102 = vector.shape_cast %101 : vector<1x256x256xbf16> to vector<256x256xbf16>
    %cst_47 = arith.constant dense<0.000000e+00> : vector<8x256xf32>
    %103 = tpu.matmul %99, %102, %cst_47 {dimension_numbers = #tpu.dot_dimension_numbers<[1], [0], [0], [1], [0, 0, 1, 1], [], []>} : vector<8x256xbf16>, vector<256x256xbf16>, vector<8x256xf32> -> vector<8x256xf32>
    %104 = tpu.iota {dimensions = array<i32: 0>} : vector<8x1xi32>
    %c0_48 = arith.constant 0 : index
    %c0_49 = arith.constant 0 : index
    %c0_50 = arith.constant 0 : index
    %105 = vector.load %arg9[%c0_48, %c0_49, %c0_50] : memref<3x256x256xbf16, #tpu.memory_space<vmem>>, vector<1x256x256xbf16>
    %106 = vector.shape_cast %105 : vector<1x256x256xbf16> to vector<256x256xbf16>
    %cst_51 = arith.constant dense<0.000000e+00> : vector<8x256xf32>
    %107 = tpu.matmul %99, %106, %cst_51 {dimension_numbers = #tpu.dot_dimension_numbers<[1], [0], [0], [1], [0, 0, 1, 1], [], []>} : vector<8x256xbf16>, vector<256x256xbf16>, vector<8x256xf32> -> vector<8x256xf32>
    %c1_i32_52 = arith.constant 1 : i32
    %108 = tpu.dynamic_rotate %107 by %c1_i32_52 dim 0 : vector<8x256xf32>, i32 -> vector<8x256xf32>
    %c-1_i32_53 = arith.constant -1 : i32
    %109 = vector.broadcast %c-1_i32_53 : i32 to vector<8x1xi32>
    %110 = arith.addi %104, %109 : vector<8x1xi32>
    %c0_i32_54 = arith.constant 0 : i32
    %111 = vector.broadcast %c0_i32_54 : i32 to vector<8x1xi32>
    %112 = arith.cmpi sge, %110, %111 : vector<8x1xi32>
    %c-1_i32_55 = arith.constant -1 : i32
    %113 = vector.broadcast %c-1_i32_55 : i32 to vector<8x1xi32>
    %114 = arith.addi %104, %113 : vector<8x1xi32>
    %c8_i32_56 = arith.constant 8 : i32
    %115 = vector.broadcast %c8_i32_56 : i32 to vector<8x1xi32>
    %116 = arith.cmpi slt, %114, %115 : vector<8x1xi32>
    %117 = arith.andi %112, %116 : vector<8x1xi1>
    %cst_57 = arith.constant 0.000000e+00 : f32
    %118 = vector.shape_cast %117 : vector<8x1xi1> to vector<8x1xi1>
    %119 = vector.broadcast %118 : vector<8x1xi1> to vector<8x256xi1>
    %120 = vector.broadcast %cst_57 : f32 to vector<8x256xf32>
    %121 = arith.select %119, %108, %120 : vector<8x256xi1>, vector<8x256xf32>
    %122 = arith.addf %103, %121 : vector<8x256xf32>
    %c2_58 = arith.constant 2 : index
    %c0_59 = arith.constant 0 : index
    %c0_60 = arith.constant 0 : index
    %123 = vector.load %arg9[%c2_58, %c0_59, %c0_60] : memref<3x256x256xbf16, #tpu.memory_space<vmem>>, vector<1x256x256xbf16>
    %124 = vector.shape_cast %123 : vector<1x256x256xbf16> to vector<256x256xbf16>
    %cst_61 = arith.constant dense<0.000000e+00> : vector<8x256xf32>
    %125 = tpu.matmul %99, %124, %cst_61 {dimension_numbers = #tpu.dot_dimension_numbers<[1], [0], [0], [1], [0, 0, 1, 1], [], []>} : vector<8x256xbf16>, vector<256x256xbf16>, vector<8x256xf32> -> vector<8x256xf32>
    %c7_i32_62 = arith.constant 7 : i32
    %126 = tpu.dynamic_rotate %125 by %c7_i32_62 dim 0 : vector<8x256xf32>, i32 -> vector<8x256xf32>
    %c1_i32_63 = arith.constant 1 : i32
    %127 = vector.broadcast %c1_i32_63 : i32 to vector<8x1xi32>
    %128 = arith.addi %104, %127 : vector<8x1xi32>
    %c0_i32_64 = arith.constant 0 : i32
    %129 = vector.broadcast %c0_i32_64 : i32 to vector<8x1xi32>
    %130 = arith.cmpi sge, %128, %129 : vector<8x1xi32>
    %c1_i32_65 = arith.constant 1 : i32
    %131 = vector.broadcast %c1_i32_65 : i32 to vector<8x1xi32>
    %132 = arith.addi %104, %131 : vector<8x1xi32>
    %c8_i32_66 = arith.constant 8 : i32
    %133 = vector.broadcast %c8_i32_66 : i32 to vector<8x1xi32>
    %134 = arith.cmpi slt, %132, %133 : vector<8x1xi32>
    %135 = arith.andi %130, %134 : vector<8x1xi1>
    %cst_67 = arith.constant 0.000000e+00 : f32
    %136 = vector.shape_cast %135 : vector<8x1xi1> to vector<8x1xi1>
    %137 = vector.broadcast %136 : vector<8x1xi1> to vector<8x256xi1>
    %138 = vector.broadcast %cst_67 : f32 to vector<8x256xf32>
    %139 = arith.select %137, %126, %138 : vector<8x256xi1>, vector<8x256xf32>
    %140 = arith.addf %122, %139 : vector<8x256xf32>
    %141 = vector.broadcast %100 : vector<1x256xf32> to vector<8x256xf32>
    %142 = arith.addf %140, %141 : vector<8x256xf32>
    %143 = arith.addf %1, %142 : vector<8x256xf32>
    %144 = arith.truncf %143 : vector<8x256xf32> to vector<8x256xbf16>
    %c0_68 = arith.constant 0 : index
    %c0_69 = arith.constant 0 : index
    %c0_70 = arith.constant 0 : index
    %145 = vector.load %arg11[%c0_68, %c0_69, %c0_70] : memref<1x8x256xbf16, #tpu.memory_space<vmem>>, vector<1x8x256xbf16>
    %146 = vector.shape_cast %145 : vector<1x8x256xbf16> to vector<8x256xbf16>
    %147 = vector.shape_cast %144 : vector<8x256xbf16> to vector<1x8x256xbf16>
    tpu.vector_store %arg11[%c0_68, %c0_69, %c0_70], %147 {strides = array<i32>} : memref<1x8x256xbf16, #tpu.memory_space<vmem>>, vector<1x8x256xbf16>,
    return
  }
  func.func @transform_0(%arg0: i32) -> (i32, i32, i32) {
    %c0_i32 = arith.constant 0 : i32
    %c0_i32_0 = arith.constant 0 : i32
    %c0_i32_1 = arith.constant 0 : i32
    return %arg0, %c0_i32, %c0_i32_0 : i32, i32, i32
  }
  func.func @transform_1(%arg0: i32) -> (i32, i32) {
    %c0_i32 = arith.constant 0 : i32
    %c0_i32_0 = arith.constant 0 : i32
    %c0_i32_1 = arith.constant 0 : i32
    return %c0_i32, %c0_i32_0 : i32, i32
  }
  func.func @transform_2(%arg0: i32) -> (i32, i32) {
    %c0_i32 = arith.constant 0 : i32
    %c0_i32_0 = arith.constant 0 : i32
    %c0_i32_1 = arith.constant 0 : i32
    return %c0_i32, %c0_i32_0 : i32, i32
  }
  func.func @transform_3(%arg0: i32) -> (i32, i32) {
    %c0_i32 = arith.constant 0 : i32
    %c0_i32_0 = arith.constant 0 : i32
    %c0_i32_1 = arith.constant 0 : i32
    return %c0_i32, %c0_i32_0 : i32, i32
  }
  func.func @transform_4(%arg0: i32) -> (i32, i32, i32) {
    %c0_i32 = arith.constant 0 : i32
    %c0_i32_0 = arith.constant 0 : i32
    %c0_i32_1 = arith.constant 0 : i32
    %c0_i32_2 = arith.constant 0 : i32
    return %c0_i32, %c0_i32_0, %c0_i32_1 : i32, i32, i32
  }
  func.func @transform_5(%arg0: i32) -> (i32, i32) {
    %c0_i32 = arith.constant 0 : i32
    %c0_i32_0 = arith.constant 0 : i32
    %c0_i32_1 = arith.constant 0 : i32
    return %c0_i32, %c0_i32_0 : i32, i32
  }
  func.func @transform_6(%arg0: i32) -> (i32, i32) {
    %c0_i32 = arith.constant 0 : i32
    %c0_i32_0 = arith.constant 0 : i32
    %c0_i32_1 = arith.constant 0 : i32
    return %c0_i32, %c0_i32_0 : i32, i32
  }
  func.func @transform_7(%arg0: i32) -> (i32, i32) {
    %c0_i32 = arith.constant 0 : i32
    %c0_i32_0 = arith.constant 0 : i32
    %c0_i32_1 = arith.constant 0 : i32
    return %c0_i32, %c0_i32_0 : i32, i32
  }
  func.func @transform_8(%arg0: i32) -> (i32, i32, i32) {
    %c0_i32 = arith.constant 0 : i32
    %c0_i32_0 = arith.constant 0 : i32
    %c0_i32_1 = arith.constant 0 : i32
    %c0_i32_2 = arith.constant 0 : i32
    return %c0_i32, %c0_i32_0, %c0_i32_1 : i32, i32, i32
  }
  func.func @transform_9(%arg0: i32) -> (i32, i32) {
    %c0_i32 = arith.constant 0 : i32
    %c0_i32_0 = arith.constant 0 : i32
    %c0_i32_1 = arith.constant 0 : i32
    return %c0_i32, %c0_i32_0 : i32, i32
  }
  func.func @transform_10(%arg0: i32) -> (i32, i32, i32) {
    %c0_i32 = arith.constant 0 : i32
    %c0_i32_0 = arith.constant 0 : i32
    %c0_i32_1 = arith.constant 0 : i32
    return %arg0, %c0_i32, %c0_i32_0 : i32, i32, i32
  }
}

</mosaic_0001>

<bundles_post_ra>
// kernel: tpu_custom_call.1
= control target key start
LH: loop header
LB: loop body
LE: loop exit
PB: predicated region body
PF: predicated region fallthrough
CT: control target
= control target key end

     0   :  { %s4738_s0 = inlined_call_operand.hbm [shape: f32[2,8,256], index: 0, kind: input, shape index: {}]   ;;  %s4739_s1 = inlined_call_operand.hbm [shape: f32[256,256], index: 1, kind: input, shape index: {}]   ;;  %s4740_s2 = inlined_call_operand.hbm [shape: f32[1,256], index: 2, kind: input, shape index: {}]   ;;  %s4741_s3 = inlined_call_operand.hbm [shape: f32[1,256], index: 3, kind: input, shape index: {}]   ;;  %s4742_s4 = inlined_call_operand.hbm [shape: bf16[3,256,256], index: 4, kind: input, shape index: {}]   ;;  %s4743_s5 = inlined_call_operand.hbm [shape: f32[1,256], index: 5, kind: input, shape index: {}]   ;;  %s4744_s6 = inlined_call_operand.hbm [shape: f32[1,256], index: 6, kind: input, shape index: {}]   ;;  %s4745_s7 = inlined_call_operand.hbm [shape: f32[1,256], index: 7, kind: input, shape index: {}]   ;;  %s4746_s8 = inlined_call_operand.hbm [shape: bf16[3,256,256], index: 8, kind: input, shape index: {}]   ;;  %s4747_s9 = inlined_call_operand.hbm [shape: f32[1,256], index: 9, kind: input, shape index: {}]   ;;  %s4748_s10 = inlined_call_operand.hbm [shape: bf16[2,8,256], index: 10, kind: output, shape index: {}]  }
   0x1   :  { %4754 = sst [smem:[#allocation28_spill]] %s4748_s10 }
   0x2   :  { %15 = vsyncpa [#allocation3], 0 }
   0x3   :  { %17 = vsyncpa [#allocation3 + $0x1], 0 }
   0x4   :  { %18 = vsyncpa [#allocation6], 0 }
   0x5   :  { %19 = vsyncpa [#allocation9], 0 }
   0x6   :  { %20 = vsyncpa [#allocation12], 0 }
   0x7   :  { %21 = vsyncpa [#allocation15], 0 }
   0x8   :  { %22 = vsyncpa [#allocation18], 0 }
   0x9   :  { %23 = vsyncpa [#allocation4], 0 }
   0xa   :  { %25 = vsyncpa [#allocation4 + $0x1], 0  ;;  %s4058_s13 = smov 0   ;;  %s4060_s14 = smov 0  }
   0xb   :  { %s4062_s15 = smov 0   ;;  %s4064_s16 = smov 0  }
   0xc LB: > { %s3988_s17 = smov [#allocation5]   ;;  %s4079_s19 = sadd.s32 4294967295, %s3986_s16   ;;  %s3986_s16 = sphi %s4064_s16, %s4783_s16   ;;  %s3982_s15 = sphi %s4062_s15, %s4782_s15   ;;  %s3978_s14 = sphi %s4060_s14, %s4781_s14   ;;  %s3974_s13 = sphi %s4058_s13, %s4780_s13  }
   0xd   : > { %s289_s18 = sshll.u32 %s3988_s17, 4  ;;  %p2676_p0 = scmp.ge.s32.totalorder %s3986_s16, 1  ;;  %s4084_s18 = int_to_ptr.vmem [resolvable:$true] %s289_s18 }
   0xe   : > { %p4751_p1 = scmp.eq.s32.totalorder %s4079_s19, 0  ;;  %p277_p2 = scmp.lt.s32.totalorder %s3986_s16, 3 }
   0xf   : > { %s3989_s21 = smov [#allocation8]   ;;  %s3990_s24 = smov [#allocation11]  }
  0x10   : > { %p4086_p3 = pnand %p2676_p0, %p277_p2  ;;  %s314_s22 = sshll.u32 %s3989_s21, 4  ;;  %s4099_s22 = int_to_ptr.vmem [resolvable:$true] %s314_s22 }
  0x11   : > { %s338_s25 = sshll.u32 %s3990_s24, 4  ;;  %s3618_s28 = scalar_lea.hbm %s4739_s1, 8192  ;;  %s4101_s25 = int_to_ptr.vmem [resolvable:$true] %s338_s25 }
  0x12   : > { %s4755_s20 = scalar_select %p4086_p3, 1, 0 }
  0x13   : > { %p3203_p5 = pneg %p4086_p3  ;;  %p3619_p7 = scmp.ne.s32.totalorder %s4739_s1, %s3618_s28 }
  0x14   : > { %4756 = sst [smem:[#allocation27_spill]] %s4755_s20  ;;  %p3625_p11 = scmp.lt.u32.totalorder %s3618_s28, %s4739_s1 }
  0x15   : > { %p4095_p6 = pnand %p3203_p5, %p4751_p1 }
  0x17   : > { %p4111_p8 = pneg %p4095_p6 }
  0x19   : > { %p3621_p9 = pnand %p4111_p8, %p3619_p7 }
  0x1b   : > { %p3622_p10 = pneg %p3621_p9 }
  0x1d   : > { %p3627_p12 = pnand %p3625_p11, %p3622_p10 }
  0x1f   : > { %3630 = shalt.err (!%p3627_p12)
}
  0x20   : > { %s3631_s21 = scalar_lea.vmem %s4084_s18, 8192  ;;  %p3639_p5 = scmp.lt.s32.totalorder %s4084_s18, %s4084_s18 }
  0x21   : > { %p3632_p13 = scmp.ne.s32.totalorder %s4084_s18, %s3631_s21  ;;  %p3640_p4 = scmp.lt.s32.totalorder %s3631_s21, %s3631_s21 }
  0x23   : > { %p3634_p0 = pnand %p3632_p13, %p4111_p8  ;;  %p3641_p7 = por %p3640_p4, %p3639_p5 }
  0x25   : > { %p3635_p2 = pneg %p3634_p0 }
  0x27   : > { %p3642_p9 = pnand %p3641_p7, %p3635_p2 }
  0x29   : > { %3645 = shalt.err (!%p3642_p9)
}
  0x2a   : > { %s3991_s24 = smov 256   ;;  %s3992_s26 = smov 16  }
  0x2b   : > { %3206 = dma.hbm_to_vmem [thread:$0]  (!%p4095_p6), %s4739_s1, 8192, %s4084_s18, [#allocation6], %s3991_s24, %s3991_s24, %s3992_s26  }
  0x2c   : > { %s3646_s12 = scalar_lea.hbm %s4741_s3, 32 }
  0x2d   : > { %p3647_p4 = scmp.ne.s32.totalorder %s4741_s3, %s3646_s12  ;;  %p3653_p12 = scmp.lt.u32.totalorder %s3646_s12, %s4741_s3 }
  0x2f   : > { %p3649_p10 = pnand %p3647_p4, %p4111_p8 }
  0x31   : > { %p3650_p11 = pneg %p3649_p10 }
  0x33   : > { %p3655_p13 = pnand %p3653_p12, %p3650_p11 }
  0x35   : > { %3658 = shalt.err (!%p3655_p13)
}
  0x36   : > { %s3659_s18 = scalar_lea.vmem %s4099_s22, 32  ;;  %p3667_p7 = scmp.lt.s32.totalorder %s4099_s22, %s4099_s22 }
  0x37   : > { %p3660_p0 = scmp.ne.s32.totalorder %s4099_s22, %s3659_s18  ;;  %p3668_p9 = scmp.lt.s32.totalorder %s3659_s18, %s3659_s18 }
  0x39   : > { %p3662_p2 = pnand %p3660_p0, %p4111_p8  ;;  %p3669_p4 = por %p3668_p9, %p3667_p7 }
  0x3b   : > { %p3663_p5 = pneg %p3662_p2 }
  0x3d   : > { %p3670_p10 = pnand %p3669_p4, %p3663_p5 }
  0x3f   : > { %3673 = shalt.err (!%p3670_p10)
}
  0x40   : > { %3212 = dma.hbm_to_vmem [thread:$0]  (!%p4095_p6), %s4741_s3, 32, %s4099_s22, [#allocation9]  }
  0x41   : > { %s3674_s27 = scalar_lea.hbm %s4743_s5, 32 }
  0x42   : > { %p3675_p11 = scmp.ne.s32.totalorder %s4743_s5, %s3674_s27  ;;  %p3681_p0 = scmp.lt.u32.totalorder %s3674_s27, %s4743_s5 }
  0x44   : > { %p3677_p12 = pnand %p3675_p11, %p4111_p8 }
  0x46   : > { %p3678_p13 = pneg %p3677_p12 }
  0x48   : > { %p3683_p2 = pnand %p3681_p0, %p3678_p13 }
  0x4a   : > { %3686 = shalt.err (!%p3683_p2)
}
  0x4b   : > { %s3687_s22 = scalar_lea.vmem %s4101_s25, 32  ;;  %p3695_p4 = scmp.lt.s32.totalorder %s4101_s25, %s4101_s25 }
  0x4c   : > { %p3688_p5 = scmp.ne.s32.totalorder %s4101_s25, %s3687_s22  ;;  %p3696_p10 = scmp.lt.s32.totalorder %s3687_s22, %s3687_s22 }
  0x4e   : > { %p3690_p7 = pnand %p3688_p5, %p4111_p8  ;;  %p3697_p11 = por %p3696_p10, %p3695_p4 }
  0x50   : > { %p3691_p9 = pneg %p3690_p7 }
  0x52   : > { %p3698_p12 = pnand %p3697_p11, %p3691_p9 }
  0x54   : > { %3701 = shalt.err (!%p3698_p12)
}
  0x55   : > { %3218 = dma.hbm_to_vmem [thread:$0]  (!%p4095_p6), %s4743_s5, 32, %s4101_s25, [#allocation12]  }
  0x56   : > { %s3993_s18 = smov [#allocation14]   ;;  %s3994_s20 = smov [#allocation7]  }
  0x57   : > { %s360_s10 = sshll.u32 %s3993_s18, 4  ;;  %s303_s24 = sshll.u32 %s3994_s20, 4  ;;  %s361_s10 = int_to_ptr.vmem [resolvable:$true] %s360_s10  ;;  %s304_s24 = int_to_ptr.vmem [resolvable:$true] %s303_s24 }
  0x58   : > { %s3702_s28 = scalar_lea.hbm %s4745_s7, 32 }
  0x59   : > { %p3703_p13 = scmp.ne.s32.totalorder %s4745_s7, %s3702_s28  ;;  %p3709_p5 = scmp.lt.u32.totalorder %s3702_s28, %s4745_s7 }
  0x5b   : > { %p3705_p0 = pnand %p3703_p13, %p4111_p8 }
  0x5d   : > { %p3706_p2 = pneg %p3705_p0 }
  0x5f   : > { %p3711_p7 = pnand %p3709_p5, %p3706_p2 }
  0x61   : > { %3714 = shalt.err (!%p3711_p7)
}
  0x62   : > { %s3715_s25 = scalar_lea.vmem %s361_s10, 32  ;;  %p3723_p11 = scmp.lt.s32.totalorder %s361_s10, %s361_s10 }
  0x63   : > { %p3716_p9 = scmp.ne.s32.totalorder %s361_s10, %s3715_s25  ;;  %p3724_p12 = scmp.lt.s32.totalorder %s3715_s25, %s3715_s25 }
  0x65   : > { %p3718_p4 = pnand %p3716_p9, %p4111_p8  ;;  %p3725_p1 = por %p3724_p12, %p3723_p11 }
  0x67   : > { %p3719_p10 = pneg %p3718_p4 }
  0x69   : > { %p3726_p3 = pnand %p3725_p1, %p3719_p10 }
  0x6b   : > { %3729 = shalt.err (!%p3726_p3)
}
  0x6c   : > { %3224 = dma.hbm_to_vmem [thread:$0]  (!%p4095_p6), %s4745_s7, 32, %s361_s10, [#allocation15]  }
  0x6d   : > { %s3730_s26 = scalar_lea.hbm %s4740_s2, 32 }
  0x6e   : > { %p3731_p13 = scmp.ne.s32.totalorder %s4740_s2, %s3730_s26  ;;  %p3737_p3 = scmp.lt.u32.totalorder %s3730_s26, %s4740_s2 }
  0x70   : > { %p3733_p0 = pnand %p3731_p13, %p4111_p8 }
  0x72   : > { %p3734_p1 = pneg %p3733_p0 }
  0x74   : > { %p3739_p2 = pnand %p3737_p3, %p3734_p1 }
  0x76   : > { %3742 = shalt.err (!%p3739_p2)
}
  0x77   : > { %s3743_s12 = scalar_lea.vmem %s304_s24, 32  ;;  %p3751_p4 = scmp.lt.s32.totalorder %s304_s24, %s304_s24 }
  0x78   : > { %p3744_p5 = scmp.ne.s32.totalorder %s304_s24, %s3743_s12  ;;  %p3752_p10 = scmp.lt.s32.totalorder %s3743_s12, %s3743_s12 }
  0x7a   : > { %p3746_p7 = pnand %p3744_p5, %p4111_p8  ;;  %p3753_p11 = por %p3752_p10, %p3751_p4 }
  0x7c   : > { %p3747_p9 = pneg %p3746_p7 }
  0x7e   : > { %p3754_p12 = pnand %p3753_p11, %p3747_p9 }
  0x80   : > { %3757 = shalt.err (!%p3754_p12)
}
  0x81   : > { %3209 = dma.hbm_to_vmem [thread:$0]  (!%p4095_p6), %s4740_s2, 32, %s304_s24, [#allocation6]  }
  0x82   : > { %s3995_s25 = smov [#allocation10]   ;;  %s3758_s20 = scalar_lea.hbm %s4742_s4, 12288 }
  0x83   : > { %s324_s17 = sshll.u32 %s3995_s25, 4  ;;  %p3759_p13 = scmp.ne.s32.totalorder %s4742_s4, %s3758_s20  ;;  %s325_s17 = int_to_ptr.vmem [resolvable:$true] %s324_s17 }
  0x84   : > { %p3765_p3 = scmp.lt.u32.totalorder %s3758_s20, %s4742_s4 }
  0x85   : > { %p3761_p0 = pnand %p3759_p13, %p4111_p8 }
  0x87   : > { %p3762_p1 = pneg %p3761_p0 }
  0x89   : > { %p3767_p2 = pnand %p3765_p3, %p3762_p1 }
  0x8b   : > { %3770 = shalt.err (!%p3767_p2)
}
  0x8c   : > { %s3771_s24 = scalar_lea.vmem %s325_s17, 12288  ;;  %p3779_p4 = scmp.lt.s32.totalorder %s325_s17, %s325_s17 }
  0x8d   : > { %p3772_p5 = scmp.ne.s32.totalorder %s325_s17, %s3771_s24  ;;  %p3780_p10 = scmp.lt.s32.totalorder %s3771_s24, %s3771_s24 }
  0x8f   : > { %p3774_p7 = pnand %p3772_p5, %p4111_p8  ;;  %p3781_p11 = por %p3780_p10, %p3779_p4 }
  0x91   : > { %p3775_p9 = pneg %p3774_p7 }
  0x93   : > { %p3782_p12 = pnand %p3781_p11, %p3775_p9 }
  0x95   : > { %3785 = shalt.err (!%p3782_p12)
}
  0x96   : > { %s3996_s30 = smov 128   ;;  %s3997_s12 = smov 8  }
  0x97   : > { %3215 = dma.hbm_to_vmem [thread:$0]  (!%p4095_p6), %s4742_s4, 12288, %s325_s17, [#allocation9], %s3996_s30, %s3996_s30, %s3997_s12  }
  0x98   : > { %s3998_s25 = smov [#allocation13]   ;;  %s3999_s18 = smov [#allocation16]  }
  0x99   : > { %s349_s21 = sshll.u32 %s3998_s25, 4  ;;  %s370_s20 = sshll.u32 %s3999_s18, 4  ;;  %s350_s21 = int_to_ptr.vmem [resolvable:$true] %s349_s21  ;;  %s4235_s20 = int_to_ptr.vmem [resolvable:$true] %s370_s20 }
  0x9a   : > { %s3786_s28 = scalar_lea.hbm %s4744_s6, 32 }
  0x9b   : > { %p3787_p13 = scmp.ne.s32.totalorder %s4744_s6, %s3786_s28  ;;  %p3793_p3 = scmp.lt.u32.totalorder %s3786_s28, %s4744_s6 }
  0x9d   : > { %p3789_p0 = pnand %p3787_p13, %p4111_p8 }
  0x9f   : > { %p3790_p1 = pneg %p3789_p0 }
  0xa1   : > { %p3795_p2 = pnand %p3793_p3, %p3790_p1 }
  0xa3   : > { %3798 = shalt.err (!%p3795_p2)
}
  0xa4   : > { %s3799_s22 = scalar_lea.vmem %s350_s21, 32  ;;  %p3807_p4 = scmp.lt.s32.totalorder %s350_s21, %s350_s21 }
  0xa5   : > { %p3800_p5 = scmp.ne.s32.totalorder %s350_s21, %s3799_s22  ;;  %p3808_p10 = scmp.lt.s32.totalorder %s3799_s22, %s3799_s22 }
  0xa7   : > { %p3802_p7 = pnand %p3800_p5, %p4111_p8  ;;  %p3809_p11 = por %p3808_p10, %p3807_p4 }
  0xa9   : > { %p3803_p9 = pneg %p3802_p7 }
  0xab   : > { %p3810_p12 = pnand %p3809_p11, %p3803_p9 }
  0xad   : > { %3813 = shalt.err (!%p3810_p12)
}
  0xae   : > { %3221 = dma.hbm_to_vmem [thread:$0]  (!%p4095_p6), %s4744_s6, 32, %s350_s21, [#allocation12]  }
  0xaf   : > { %s3814_s28 = scalar_lea.hbm %s4746_s8, 12288 }
  0xb0   : > { %p3815_p13 = scmp.ne.s32.totalorder %s4746_s8, %s3814_s28  ;;  %p3821_p3 = scmp.lt.u32.totalorder %s3814_s28, %s4746_s8 }
  0xb2   : > { %p3817_p0 = pnand %p3815_p13, %p4111_p8 }
  0xb4   : > { %p3818_p1 = pneg %p3817_p0 }
  0xb6   : > { %p3823_p2 = pnand %p3821_p3, %p3818_p1 }
  0xb8   : > { %3826 = shalt.err (!%p3823_p2)
}
  0xb9   : > { %s3827_s21 = scalar_lea.vmem %s4235_s20, 12288  ;;  %p3835_p4 = scmp.lt.s32.totalorder %s4235_s20, %s4235_s20 }
  0xba   : > { %p3828_p5 = scmp.ne.s32.totalorder %s4235_s20, %s3827_s21  ;;  %p3836_p10 = scmp.lt.s32.totalorder %s3827_s21, %s3827_s21 }
  0xbc   : > { %p3830_p7 = pnand %p3828_p5, %p4111_p8  ;;  %p3837_p11 = por %p3836_p10, %p3835_p4 }
  0xbe   : > { %p3831_p9 = pneg %p3830_p7 }
  0xc0   : > { %p3838_p12 = pnand %p3837_p11, %p3831_p9 }
  0xc2   : > { %3841 = shalt.err (!%p3838_p12)
}
  0xc3   : > { %3227 = dma.hbm_to_vmem [thread:$0]  (!%p4095_p6), %s4746_s8, 12288, %s4235_s20, [#allocation15], %s3996_s30, %s3996_s30, %s3997_s12  }
  0xc4   : > { %s4000_s18 = smov [#allocation17]   ;;  %s3842_s29 = scalar_lea.hbm %s4747_s9, 32 }
  0xc5   : > { %s384_s26 = sshll.u32 %s4000_s18, 4  ;;  %p3843_p13 = scmp.ne.s32.totalorder %s4747_s9, %s3842_s29  ;;  %s385_s26 = int_to_ptr.vmem [resolvable:$true] %s384_s26 }
  0xc6   : > { %p3849_p3 = scmp.lt.u32.totalorder %s3842_s29, %s4747_s9 }
  0xc7   : > { %p3845_p0 = pnand %p3843_p13, %p4111_p8 }
  0xc9   : > { %p3846_p1 = pneg %p3845_p0 }
  0xcb   : > { %p3851_p2 = pnand %p3849_p3, %p3846_p1 }
  0xcd   : > { %3854 = shalt.err (!%p3851_p2)
}
  0xce   : > { %s3855_s30 = scalar_lea.vmem %s385_s26, 32  ;;  %p3863_p4 = scmp.lt.s32.totalorder %s385_s26, %s385_s26 }
  0xcf   : > { %p3856_p5 = scmp.ne.s32.totalorder %s385_s26, %s3855_s30  ;;  %p3864_p10 = scmp.lt.s32.totalorder %s3855_s30, %s3855_s30 }
  0xd1   : > { %p3858_p7 = pnand %p3856_p5, %p4111_p8  ;;  %p3865_p11 = por %p3864_p10, %p3863_p4 }
  0xd3   : > { %p3859_p9 = pneg %p3858_p7 }
  0xd5   : > { %p3866_p12 = pnand %p3865_p11, %p3859_p9 }
  0xd7   : > { %3869 = shalt.err (!%p3866_p12)
}
  0xd8   : > { %3230 = dma.hbm_to_vmem [thread:$0]  (!%p4095_p6), %s4747_s9, 32, %s385_s26, [#allocation18]  }
  0xd9   : > { %s2675_s11 = sadd.s32 4294967294, %s3986_s16   ;;  %s4301_s23 = sadd.s32 1, %s3986_s16  }
  0xda   : > { %s38_s22 = sadd.s32 1, %s3982_s15  ;;  %s35_s25 = ssub.s32 %s3986_s16, %s4301_s23 }
  0xdb   : > { %p45_p8 = scmp.ne.s32.totalorder %s3982_s15, %s3978_s14  ;;  %p36_p13 = scmp.eq.s32.totalorder %s35_s25, 0 }
  0xdc   : > { %p46_p0 = scmp.eq.s32.totalorder %s3986_s16, 0  ;;  %p51_p1 = scmp.ne.s32.totalorder %s3978_s14, %s3974_s13 }
  0xdd   : > { %p264_p3 = scmp.eq.s32.totalorder %s4079_s19, 1  ;;  %p4759_p5 = scmp.eq.s32.totalorder %s4079_s19, 0 }
  0xde   : > { %s4313_s18 = scalar_select %p36_p13, %s3982_s15, %s38_s22  }
  0xdf   : > { %p47_p2 = por %p46_p0, %p45_p8  ;;  %p4317_p7 = por %p4759_p5, %p51_p1 }
  0xe0   : > { %p4321_p6 = por %p264_p3, %p45_p8  ;;  %p270_p9 = scmp.eq.s32.totalorder %s2675_s11, 1 }
  0xe1   : > { %p3248_p4 = scmp.lt.s32.totalorder %s3986_s16, 2  ;;  %s395_s28 = sand.u32 1, %s3982_s15  }
  0xe2   : > { %s4761_s26 = scalar_select %p4321_p6, 1, 0 }
  0xe3   : > { %p4327_p10 = por %p270_p9, %p51_p1  ;;  %s2687_s24 = sshll.u32 %s395_s28, 4 }
  0xe4   : > { %s2904_s10 = sshll.u32 %s3986_s16, 8  ;;  %s399_s12 = scalar_lea.vmem [#allocation2], %s2687_s24 }
  0xe5   : > { %s4762_s29 = scalar_select %p4327_p10, 1, 0 }
  0xe6   : > { %s4335_s30 = scalar_lea.hbm %s4738_s0, %s2904_s10  ;;  %s407_s20 = sshll.u32 %s399_s12, 4  ;;  %s4341_s20 = int_to_ptr.vmem [resolvable:$true] %s407_s20 }
  0xe7   : > { %p4337_p11 = pnand %p3248_p4, %p47_p2  ;;  %s396_s22 = scalar_lea.sflag [#allocation3], %s395_s28 }
  0xe8   : > { %s3870_s25 = scalar_lea.hbm %s4335_s30, 256  ;;  %s3875_s17 = scalar_lea.hbm %s4738_s0, 512 }
  0xe9   : > { %p3871_p12 = scmp.ne.s32.totalorder %s4335_s30, %s3870_s25  ;;  %p3872_p8 = pneg %p4337_p11 }
  0xea   : > { %p3876_p1 = scmp.lt.u32.totalorder %s4335_s30, %s4738_s0  ;;  %p3877_p3 = scmp.lt.u32.totalorder %s3875_s17, %s3870_s25 }
  0xeb   : > { %p3873_p13 = pnand %p3872_p8, %p3871_p12  ;;  %p3879_p5 = scmp.lt.u32.totalorder %s3870_s25, %s4335_s30 }
  0xec   : > { %p3878_p2 = por %p3877_p3, %p3876_p1 }
  0xed   : > { %p3874_p0 = pneg %p3873_p13 }
  0xee   : > { %p3880_p9 = por %p3879_p5, %p3878_p2 }
  0xf0   : > { %p3881_p4 = pnand %p3880_p9, %p3874_p0 }
  0xf2   : > { %3884 = shalt.err (!%p3881_p4)
}
  0xf3   : > { %s3885_s28 = scalar_lea.vmem %s4341_s20, 256  ;;  %s4001_s10 = smov [#allocation2]  }
  0xf4   : > { %p3886_p12 = scmp.ne.s32.totalorder %s4341_s20, %s3885_s28  ;;  %s3890_s24 = sshll.u32 %s4001_s10, 4  ;;  %s3891_s24 = int_to_ptr.vmem [resolvable:$false] %s3890_s24 }
  0xf5   : > { %s3892_s21 = scalar_lea.vmem %s3891_s24, 512  ;;  %p3893_p6 = scmp.lt.s32.totalorder %s4341_s20, %s3891_s24 }
  0xf6   : > { %p3888_p13 = pnand %p3886_p12, %p3872_p8  ;;  %p3894_p1 = scmp.lt.s32.totalorder %s3892_s21, %s3885_s28 }
  0xf8   : > { %p3889_p10 = pneg %p3888_p13  ;;  %p3895_p3 = por %p3894_p1, %p3893_p6 }
  0xfa   : > { %p3896_p2 = pnand %p3895_p3, %p3889_p10 }
  0xfc   : > { %3899 = shalt.err (!%p3896_p2)
}
  0xfd   : > { %3234 = dma.hbm_to_vmem [thread:$0]  (!%p4337_p11), %s4335_s30, 256, %s4341_s20, %s396_s22  }
  0xfe   : > { %s4764_s25 = sld [smem:[#allocation27_spill]] }
 0x104   : > { %p4765_p0 = scmp.ne.s32.totalorder %s4764_s25, 0 }
 0x105   : > { %s4371_s17 = sand.u32 (!%p4765_p0), 1, %s3978_s14  }
 0x106   : > { %416 = sbr.rel (%p4765_p0) target bundleno = 1946 (0x79a), region = 60  ;;  %s2691_s12 = sshll.u32 (!%p4765_p0), %s4371_s17, 4 }
 0x107   : > { %s419_s10 = scalar_lea.sflag (!%p4765_p0), [#allocation3], %s4371_s17  ;;  %s4375_s28 = scalar_lea.vmem (!%p4765_p0), [#allocation2], %s2691_s12 }
 0x10d   : > { %3945 = dma.done.wait (%p4317_p7), %s419_s10, 256  }
 0x10e   : > { %3947 = vsyncadd (%p4317_p7), %s419_s10, 4294967040  ;;  %p4766_p6 = scmp.eq.s32.totalorder %s4079_s19, 0 }
 0x110   : > { %3949 = dma.done.wait (%p4766_p6), [#allocation6], 8224   ;;  %p4767_p10 = pmov %p4766_p6 }
 0x111   : > { %p4768_p11 = pmov %p4766_p6 }
 0x112   : > { %3951 = vsyncadd (%p4767_p10), [#allocation6], 4294959072 }
 0x113   : > { %3953 = dma.done.wait (%p4768_p11), [#allocation9], 12320   ;;  %p4769_p8 = pmov %p4766_p6 }
 0x114   : > { %p4770_p5 = pmov %p4766_p6 }
 0x115   : > { %3955 = vsyncadd (%p4769_p8), [#allocation9], 4294954976 }
 0x116   : > { %3957 = dma.done.wait (%p4770_p5), [#allocation12], 64   ;;  %p4771_p9 = pmov %p4770_p5 }
 0x117   : > { %p4772_p7 = pmov %p4770_p5 }
 0x118   : > { %3959 = vsyncadd (%p4771_p9), [#allocation12], 4294967232 }
 0x119   : > { %3961 = dma.done.wait (%p4772_p7), [#allocation15], 12320   ;;  %p4773_p4 = pmov %p4770_p5 }
 0x11b   : > { %3963 = vsyncadd (%p4773_p4), [#allocation15], 4294954976  ;;  %p4774_p12 = pmov %p4773_p4 }
 0x11c   : > { %p4775_p13 = pmov %p4773_p4 }
 0x11d   : > { %3965 = dma.done.wait (%p4774_p12), [#allocation18], 32  }
 0x11e   : > { %3967 = vsyncadd (%p4775_p13), [#allocation18], 4294967264  ;;  %v498_v0 = vld [vmem:[#allocation5 + $0x8] sm:$0xff]  ;;  %v500_v1 = vld [vmem:[#allocation5 + $0x18] sm:$0xff]  ;;  %s2701_s27 = sshll.u32 %s4371_s17, 3  ;;  %s2906_s30 = sshll.u32 %s4079_s19, 7 }
 0x11f   : > { %v497_v2 = vld [vmem:[#allocation5] sm:$0xff]  ;;  %v4401_v3 = vpack.c.bf16 %v500_v1, %v498_v0  ;;  %v499_v4 = vld [vmem:[#allocation5 + $0x10] sm:$0xff]  ;;  %v502_v5 = vld [vmem:[#allocation5 + $0x28] sm:$0xff]  ;;  %s494_s20 = scalar_lea.vmem [#allocation19], %s2701_s27  ;;  %s4776_s21 = sld [smem:[#allocation28_spill]] }
 0x120   : > { %v504_v6 = vld [vmem:[#allocation5 + $0x38] sm:$0xff]  ;;  %v4403_v7 = vpack.c.bf16 %v499_v4, %v497_v2  ;;  %v501_v9 = vld [vmem:[#allocation5 + $0x20] sm:$0xff]  ;;  %v503_v10 = vld [vmem:[#allocation5 + $0x30] sm:$0xff]  ;;  %s2519_s11 = sshll.u32 %s494_s20, 4  ;;  %s2505_s12 = scalar_lea.sflag [#allocation4], %s4371_s17  ;;  %s4696_s11 = int_to_ptr.vmem [resolvable:$true] %s2519_s11 }
 0x121   : > { %v4405_v8 = vpack.c.bf16 %v504_v6, %v502_v5  ;;  %v506_v11 = vld [vmem:[#allocation5 + $0x48] sm:$0xff]  ;;  %2908 = vmatprep.subr.bf16.mxu0 %v4401_v3  ;;  %v508_v12 = vld [vmem:[#allocation5 + $0x58] sm:$0xff]  ;;  %2972 = vmatprep.subr.bf16.mxu1 %v4401_v3  ;;  %v4410_v13 = vpack.c.bf16 %v503_v10, %v501_v9  ;;  %v505_v15 = vld [vmem:[#allocation5 + $0x40] sm:$0xff]  ;;  %s3900_s10 = scalar_lea.vmem %s4696_s11, 128  ;;  %p4777_p3 = scmp.ne.s32.totalorder %s4761_s26, 0 }
 0x122   : > { %2910 = vmatpush1.bf16.msra.mxu0 %v4403_v7  ;;  %2974 = vmatpush1.bf16.msra.mxu1 %v4403_v7  ;;  %v4414_v14 = vpack.c.bf16 %v508_v12, %v506_v11  ;;  %v507_v16 = vld [vmem:[#allocation5 + $0x50] sm:$0xff]  ;;  %v510_v17 = vld [vmem:[#allocation5 + $0x68] sm:$0xff]  ;;  %v512_v18 = vld [vmem:[#allocation5 + $0x78] sm:$0xff]  ;;  %p3901_p1 = scmp.ne.s32.totalorder %s4696_s11, %s3900_s10  ;;  %s4002_s19 = smov [#allocation19]  }
 0x123   : > { %2912 = vmatprep.subr.bf16.mxu0 %v4405_v8  ;;  %2976 = vmatprep.subr.bf16.mxu1 %v4405_v8  ;;  %v4418_v19 = vpack.c.bf16 %v507_v16, %v505_v15  ;;  %v4422_v20 = vpack.c.bf16 %v512_v18, %v510_v17  ;;  %v509_v21 = vld [vmem:[#allocation5 + $0x60] sm:$0xff]  ;;  %v511_v22 = vld [vmem:[#allocation5 + $0x70] sm:$0xff]  ;;  %v514_v23 = vld [vmem:[#allocation5 + $0x88] sm:$0xff] }
 0x124   : > { %v516_v24 = vld [vmem:[#allocation5 + $0x98] sm:$0xff]  ;;  %v4426_v25 = vpack.c.bf16 %v511_v22, %v509_v21  ;;  %v513_v27 = vld [vmem:[#allocation5 + $0x80] sm:$0xff]  ;;  %v515_v28 = vld [vmem:[#allocation5 + $0x90] sm:$0xff]  ;;  %p3902_p2 = pnand %p3901_p1, %p4777_p3 }
 0x125   : > { %v4430_v26 = vpack.c.bf16 %v516_v24, %v514_v23  ;;  %v518_v29 = vld [vmem:[#allocation5 + $0xa8] sm:$0xff]  ;;  %v520_v30 = vld [vmem:[#allocation5 + $0xb8] sm:$0xff]  ;;  %v4434_v31 = vpack.c.bf16 %v515_v28, %v513_v27  ;;  %v517_v33 = vld [vmem:[#allocation5 + $0xa0] sm:$0xff]  ;;  %s4694_s25 = scalar_lea.hbm %s4776_s21, %s2906_s30 }
 0x126   : > { %2914 = vmatpush1.bf16.msra.mxu0 %v4410_v13  ;;  %2978 = vmatpush1.bf16.msra.mxu1 %v4410_v13  ;;  %v4438_v32 = vpack.c.bf16 %v520_v30, %v518_v29  ;;  %v519_v34 = vld [vmem:[#allocation5 + $0xb0] sm:$0xff]  ;;  %v522_v35 = vld [vmem:[#allocation5 + $0xc8] sm:$0xff]  ;;  %v524_v36 = vld [vmem:[#allocation5 + $0xd8] sm:$0xff]  ;;  %p3903_p0 = pneg %p3902_p2 }
 0x127   : > { %2916 = vmatprep.subr.bf16.mxu0 %v4414_v14  ;;  %2980 = vmatprep.subr.bf16.mxu1 %v4414_v14  ;;  %v4442_v37 = vpack.c.bf16 %v519_v34, %v517_v33  ;;  %v521_v38 = vld [vmem:[#allocation5 + $0xc0] sm:$0xff]  ;;  %v523_v39 = vld [vmem:[#allocation5 + $0xd0] sm:$0xff]  ;;  %v4446_v40 = vpack.c.bf16 %v524_v36, %v522_v35  ;;  %v526_v41 = vld [vmem:[#allocation5 + $0xe8] sm:$0xff] }
 0x128   : > { %v528_v42 = vld [vmem:[#allocation5 + $0xf8] sm:$0xff]  ;;  %v525_v45 = vld [vmem:[#allocation5 + $0xe0] sm:$0xff]  ;;  %v527_v46 = vld [vmem:[#allocation5 + $0xf0] sm:$0xff]  ;;  %v4454_v47 = vpack.c.bf16 %v523_v39, %v521_v38 }
 0x129   : > { %v4449_v43 = vld [vmem:[%s4375_s28 + $0x8] sm:$0xff]  ;;  %v4459_v51 = vpack.c.bf16 %v528_v42, %v526_v41  ;;  %v529_v53 = vld [vmem:[#allocation5 + $0x100] sm:$0xff]  ;;  %v531_v54 = vld [vmem:[#allocation5 + $0x110] sm:$0xff]  ;;  %v4463_v55 = vpack.c.bf16 %v527_v46, %v525_v45 }
 0x12a   : > { %2918 = vmatpush1.bf16.msra.mxu0 %v4418_v19  ;;  %2982 = vmatpush1.bf16.msra.mxu1 %v4418_v19  ;;  %v569_v44 = vrot.slane %v4449_v43, 4  ;;  %v530_v48 = vld [vmem:[#allocation5 + $0x108] sm:$0xff]  ;;  %v532_v49 = vld [vmem:[#allocation5 + $0x118] sm:$0xff]  ;;  %v533_v61 = vld [vmem:[#allocation5 + $0x120] sm:$0xff]  ;;  %v4471_v63 = vpack.c.bf16 %v531_v54, %v529_v53 }
 0x12b   : > { %2920 = vmatprep.subr.bf16.mxu0 %v4422_v20  ;;  %2984 = vmatprep.subr.bf16.mxu1 %v4422_v20  ;;  %v534_v56 = vld [vmem:[#allocation5 + $0x128] sm:$0xff]  ;;  %v536_v57 = vld [vmem:[#allocation5 + $0x138] sm:$0xff]  ;;  %v4467_v59 = vpack.c.bf16 %v532_v49, %v530_v48  ;;  %v535_v62 = vld [vmem:[#allocation5 + $0x130] sm:$0xff] }
 0x12c   : > { %v570_v50 = vadd.f32 %v569_v44, %v4449_v43  ;;  %v538_v0 = vld [vmem:[#allocation5 + $0x148] sm:$0xff]  ;;  %v540_v1 = vld [vmem:[#allocation5 + $0x158] sm:$0xff]  ;;  %v4475_v4 = vpack.c.bf16 %v536_v57, %v534_v56  ;;  %v537_v5 = vld [vmem:[#allocation5 + $0x140] sm:$0xff]  ;;  %v4479_v9 = vpack.c.bf16 %v535_v62, %v533_v61 }
 0x12d   : > { %v539_v6 = vld [vmem:[#allocation5 + $0x150] sm:$0xff]  ;;  %v542_v10 = vld [vmem:[#allocation5 + $0x168] sm:$0xff]  ;;  %v544_v11 = vld [vmem:[#allocation5 + $0x178] sm:$0xff]  ;;  %v4483_v12 = vpack.c.bf16 %v540_v1, %v538_v0 }
 0x12e   : > { %2922 = vmatpush1.bf16.msra.mxu0 %v4426_v25  ;;  %2986 = vmatpush1.bf16.msra.mxu1 %v4426_v25  ;;  %v571_v52 = vrot.slane %v570_v50, 2  ;;  %v4487_v15 = vld [vmem:[%s4375_s28] sm:$0xff]  ;;  %v4490_v18 = vpack.c.bf16 %v539_v6, %v537_v5  ;;  %v546_v21 = vld [vmem:[#allocation5 + $0x188] sm:$0xff]  ;;  %v548_v22 = vld [vmem:[#allocation5 + $0x198] sm:$0xff]  ;;  %v4494_v23 = vpack.c.bf16 %v544_v11, %v542_v10 }
 0x12f   : > { %2924 = vmatprep.subr.bf16.mxu0 %v4430_v26  ;;  %2988 = vmatprep.subr.bf16.mxu1 %v4430_v26  ;;  %v541_v16 = vld [vmem:[#allocation5 + $0x160] sm:$0xff]  ;;  %v543_v17 = vld [vmem:[#allocation5 + $0x170] sm:$0xff]  ;;  %v563_v28 = vrot.slane %v4487_v15, 4  ;;  %v550_v30 = vld [vmem:[#allocation5 + $0x1a8] sm:$0xff]  ;;  %v4503_v34 = vpack.c.bf16 %v548_v22, %v546_v21 }
 0x130   : > { %v572_v58 = vadd.f32 %v571_v52, %v570_v50  ;;  %v545_v24 = vld [vmem:[#allocation5 + $0x180] sm:$0xff]  ;;  %v547_v27 = vld [vmem:[#allocation5 + $0x190] sm:$0xff]  ;;  %v4499_v29 = vpack.c.bf16 %v543_v17, %v541_v16  ;;  %v552_v33 = vld [vmem:[#allocation5 + $0x1b8] sm:$0xff]  ;;  %v646_v17 = vlaneseq }
 0x131   : > { %v549_v35 = vld [vmem:[#allocation5 + $0x1a0] sm:$0xff]  ;;  %v551_v36 = vld [vmem:[#allocation5 + $0x1b0] sm:$0xff]  ;;  %v564_v38 = vadd.f32 %v563_v28, %v4487_v15  ;;  %v4508_v39 = vpack.c.bf16 %v547_v27, %v545_v24  ;;  %v554_v41 = vld [vmem:[#allocation5 + $0x1c8] sm:$0xff]  ;;  %v4512_v44 = vpack.c.bf16 %v552_v33, %v550_v30 }
 0x132   : > { %2926 = vmatpush1.bf16.msra.mxu0 %v4434_v31  ;;  %2990 = vmatpush1.bf16.msra.mxu1 %v4434_v31  ;;  %v573_v60 = vrot.slane %v572_v58, 1  ;;  %v556_v42 = vld [vmem:[#allocation5 + $0x1d8] sm:$0xff]  ;;  %v553_v45 = vld [vmem:[#allocation5 + $0x1c0] sm:$0xff]  ;;  %v555_v46 = vld [vmem:[#allocation5 + $0x1d0] sm:$0xff]  ;;  %v4516_v49 = vpack.c.bf16 %v551_v36, %v549_v35  ;;  %v4539_v21 = vshrl.u32 %v646_v17, 7 }
 0x133   : > { %2928 = vmatprep.subr.bf16.mxu0 %v4438_v32  ;;  %2992 = vmatprep.subr.bf16.mxu1 %v4438_v32  ;;  %v565_v48 = vrot.slane %v564_v38, 2  ;;  %v558_v50 = vld [vmem:[#allocation5 + $0x1e8] sm:$0xff]  ;;  %v560_v52 = vld [vmem:[#allocation5 + $0x1f8] sm:$0xff]  ;;  %v4520_v53 = vpack.c.bf16 %v556_v42, %v554_v41  ;;  %v557_v54 = vld [vmem:[#allocation5 + $0x1e0] sm:$0xff] }
 0x134   : > { %v574_v2 = vadd.f32 %v573_v60, %v572_v58  ;;  %v559_v56 = vld [vmem:[#allocation5 + $0x1f0] sm:$0xff]  ;;  %v4524_v58 = vpack.c.bf16 %v555_v46, %v553_v45  ;;  %v4528_v60 = vpack.c.bf16 %v560_v52, %v558_v50  ;;  %v3304_v1 = vld [vmem:[#allocation10] ss:$8 sps:$4 sm:$0xff]   ;;  %v3312_v6 = vld [vmem:[#allocation10 + $0x14] ss:$8 sps:$4 sm:$0xff]   ;;  %v4542_v22 = vsub.s32 0, %v4539_v21 }
 0x135   : > { %v566_v57 = vadd.f32 %v565_v48, %v564_v38  ;;  %v4532_v62 = vpack.c.bf16 %v559_v56, %v557_v54  ;;  %v3309_v5 = vld [vmem:[#allocation10 + $0x104] ss:$8 sps:$4 sm:$0xff]   ;;  %v3310_v10 = vld [vmem:[#allocation10 + $0x10] ss:$8 sps:$4 sm:$0xff]   ;;  %v3316_v16 = vld [vmem:[#allocation10 + $0x20] ss:$8 sps:$4 sm:$0xff]  }
 0x136   : > { %2930 = vmatpush1.bf16.msra.mxu0 %v4442_v37  ;;  %2994 = vmatpush1.bf16.msra.mxu1 %v4442_v37  ;;  %v3318_v11 = vld [vmem:[#allocation10 + $0x24] ss:$8 sps:$4 sm:$0xff]  }
 0x137   : > { %2932 = vmatprep.subr.bf16.mxu0 %v4446_v40  ;;  %2996 = vmatprep.subr.bf16.mxu1 %v4446_v40  ;;  %v567_v61 = vrot.slane %v566_v57, 1  ;;  %v3330_v17 = vld [vmem:[#allocation10 + $0x44] ss:$8 sps:$4 sm:$0xff]  }
 0x138   : > { %639 = vmatprep.mubr.f32.mxu0 %v574_v2  ;;  %v3306_v2 = vld [vmem:[#allocation10 + $0x4] ss:$8 sps:$4 sm:$0xff]  }
 0x139   : > { %v568_v0 = vadd.f32 %v567_v61, %v566_v57  ;;  %v3307_v61 = vld [vmem:[#allocation10 + $0x100] ss:$8 sps:$4 sm:$0xff]  }
 0x13a   : > { %2934 = vmatpush1.bf16.msra.mxu0 %v4454_v47  ;;  %2998 = vmatpush1.bf16.msra.mxu1 %v4454_v47 }
 0x13b   : > { %2936 = vmatprep.subr.bf16.mxu0 %v4459_v51  ;;  %3000 = vmatprep.subr.bf16.mxu1 %v4459_v51 }
 0x13e   : > { %2938 = vmatpush1.bf16.msra.mxu0 %v4463_v55  ;;  %3002 = vmatpush1.bf16.msra.mxu1 %v4463_v55 }
 0x13f   : > { %2940 = vmatprep.subr.bf16.mxu0 %v4467_v59  ;;  %3004 = vmatprep.subr.bf16.mxu1 %v4467_v59 }
 0x142   : > { %2942 = vmatpush1.bf16.msra.mxu0 %v4471_v63  ;;  %3006 = vmatpush1.bf16.msra.mxu1 %v4471_v63 }
 0x143   : > { %2944 = vmatprep.subr.bf16.mxu0 %v4475_v4  ;;  %3008 = vmatprep.subr.bf16.mxu1 %v4475_v4 }
 0x146   : > { %2946 = vmatpush1.bf16.msra.mxu0 %v4479_v9  ;;  %3010 = vmatpush1.bf16.msra.mxu1 %v4479_v9 }
 0x147   : > { %2948 = vmatprep.subr.bf16.mxu0 %v4483_v12  ;;  %3012 = vmatprep.subr.bf16.mxu1 %v4483_v12 }
 0x14a   : > { %2950 = vmatpush1.bf16.msra.mxu0 %v4490_v18  ;;  %3014 = vmatpush1.bf16.msra.mxu1 %v4490_v18 }
 0x14b   : > { %2952 = vmatprep.subr.bf16.mxu0 %v4494_v23  ;;  %3016 = vmatprep.subr.bf16.mxu1 %v4494_v23 }
 0x14e   : > { %2954 = vmatpush1.bf16.msra.mxu0 %v4499_v29  ;;  %3018 = vmatpush1.bf16.msra.mxu1 %v4499_v29 }
 0x14f   : > { %2956 = vmatprep.subr.bf16.mxu0 %v4503_v34  ;;  %3020 = vmatprep.subr.bf16.mxu1 %v4503_v34 }
 0x152   : > { %2958 = vmatpush1.bf16.msra.mxu0 %v4508_v39  ;;  %3022 = vmatpush1.bf16.msra.mxu1 %v4508_v39 }
 0x153   : > { %2960 = vmatprep.subr.bf16.mxu0 %v4512_v44  ;;  %3024 = vmatprep.subr.bf16.mxu1 %v4512_v44 }
 0x156   : > { %2962 = vmatpush1.bf16.msra.mxu0 %v4516_v49  ;;  %3026 = vmatpush1.bf16.msra.mxu1 %v4516_v49 }
 0x157   : > { %2964 = vmatprep.subr.bf16.mxu0 %v4520_v53  ;;  %3028 = vmatprep.subr.bf16.mxu1 %v4520_v53 }
 0x15a   : > { %2966 = vmatpush1.bf16.msra.mxu0 %v4524_v58  ;;  %3030 = vmatpush1.bf16.msra.mxu1 %v4524_v58 }
 0x15b   : > { %2968 = vmatprep.subr.bf16.mxu0 %v4528_v60  ;;  %3032 = vmatprep.subr.bf16.mxu1 %v4528_v60 }
 0x15e   : > { %2970 = vmatpush1.bf16.msra.mxu0 %v4532_v62  ;;  %3034 = vmatpush1.bf16.msra.mxu1 %v4532_v62 }
 0x15f   : > { %1023 = vmatprep.subr.bf16.mxu0 %v3306_v2  ;;  %1234 = vmatprep.subr.bf16.mxu1 %v3309_v5  ;;  %v3321_v2 = vld [vmem:[#allocation10 + $0x124] ss:$8 sps:$4 sm:$0xff]   ;;  %v3319_v5 = vld [vmem:[#allocation10 + $0x120] ss:$8 sps:$4 sm:$0xff]  }
 0x161   : > { %640 = vmatmul.mubr.f32.vlgmr.msra.gmra.mrb[0].mxu0 %v568_v0  ;;  %v3315_v0 = vld [vmem:[#allocation10 + $0x114] ss:$8 sps:$4 sm:$0xff]  }
 0x162   : > { %1024 = vmatpush1.bf16.msra.mxu0 %v3304_v1  ;;  %v3313_v1 = vld [vmem:[#allocation10 + $0x110] ss:$8 sps:$4 sm:$0xff]  }
 0x163   : > { %1025 = vmatprep.subr.bf16.mxu0 %v3312_v6  ;;  %v3324_v6 = vld [vmem:[#allocation10 + $0x34] ss:$8 sps:$4 sm:$0xff]  }
 0x166   : > { %1026 = vmatpush1.bf16.msra.mxu0 %v3310_v10  ;;  %v3322_v10 = vld [vmem:[#allocation10 + $0x30] ss:$8 sps:$4 sm:$0xff]  }
 0x167   : > { %1027 = vmatprep.subr.bf16.mxu0 %v3318_v11  ;;  %v3327_v11 = vld [vmem:[#allocation10 + $0x134] ss:$8 sps:$4 sm:$0xff]  }
 0x16a   : > { %1028 = vmatpush1.bf16.msra.mxu0 %v3316_v16  ;;  %v3325_v16 = vld [vmem:[#allocation10 + $0x130] ss:$8 sps:$4 sm:$0xff]  }
 0x16b   : > { %1029 = vmatprep.subr.bf16.mxu0 %v3324_v6  ;;  %v3366_v6 = vld [vmem:[#allocation10 + $0xa4] ss:$8 sps:$4 sm:$0xff]  }
 0x16e   : > { %1030 = vmatpush1.bf16.msra.mxu0 %v3322_v10  ;;  %v3369_v10 = vld [vmem:[#allocation10 + $0x1a4] ss:$8 sps:$4 sm:$0xff]  }
 0x16f   : > { %1031 = vmatprep.subr.bf16.mxu0 %v3330_v17  ;;  %v3372_v17 = vld [vmem:[#allocation10 + $0xb4] ss:$8 sps:$4 sm:$0xff]  }
 0x234   : > { %v641_v24 = vpop.f32.mrb[0].mxu0 }
 0x235   : > { %v649_v27 = vrot.slane %v641_v24, %v4542_v22  ;;  %v643_v28 = vpop.f32.mrb[1].mxu0  ;;  %v3328_v24 = vld [vmem:[#allocation10 + $0x40] ss:$8 sps:$4 sm:$0xff]  }
 0x236   : > { %v653_v30 = vrot.slane %v643_v28, %v4542_v22  ;;  %v3331_v28 = vld [vmem:[#allocation10 + $0x140] ss:$8 sps:$4 sm:$0xff]   ;;  %1032 = vmatpush1.bf16.msra.mxu0 %v3328_v24  ;;  %v3375_v24 = vld [vmem:[#allocation10 + $0x1b4] ss:$8 sps:$4 sm:$0xff]  }
 0x237   : > { %v4547_v33 = vsub.f32 %v4487_v15, %v649_v27  ;;  %v3333_v27 = vld [vmem:[#allocation10 + $0x144] ss:$8 sps:$4 sm:$0xff]  }
 0x238   : > { %v4550_v35 = vsub.f32 %v4449_v43, %v653_v30  ;;  %v3336_v30 = vld [vmem:[#allocation10 + $0x54] ss:$8 sps:$4 sm:$0xff]  }
 0x239   : > { %v656_v36 = vmul.f32 %v4547_v33, %v4547_v33  ;;  %1033 = vmatprep.subr.bf16.mxu0 %v3336_v30  ;;  %v3378_v30 = vld [vmem:[#allocation10 + $0xc4] ss:$8 sps:$4 sm:$0xff]  }
 0x23a   : > { %v657_v38 = vmul.f32 %v4550_v35, %v4550_v35 }
 0x23b   : > { %v658_v41 = vrot.slane %v656_v36, 4 }
 0x23c   : > { %v664_v42 = vrot.slane %v657_v38, 4 }
 0x23d   : > { %v659_v45 = vadd.f32 %v658_v41, %v656_v36  ;;  %v3334_v36 = vld [vmem:[#allocation10 + $0x50] ss:$8 sps:$4 sm:$0xff]  }
 0x23e   : > { %v665_v46 = vadd.f32 %v664_v42, %v657_v38  ;;  %v3339_v38 = vld [vmem:[#allocation10 + $0x154] ss:$8 sps:$4 sm:$0xff]   ;;  %v3337_v41 = vld [vmem:[#allocation10 + $0x150] ss:$8 sps:$4 sm:$0xff]   ;;  %1034 = vmatpush1.bf16.msra.mxu0 %v3334_v36  ;;  %v3342_v42 = vld [vmem:[#allocation10 + $0x64] ss:$8 sps:$4 sm:$0xff]  }
 0x23f   : > { %v660_v48 = vrot.slane %v659_v45, 2  ;;  %1035 = vmatprep.subr.bf16.mxu0 %v3342_v42  ;;  %v3381_v36 = vld [vmem:[#allocation10 + $0x1c4] ss:$8 sps:$4 sm:$0xff]   ;;  %v3384_v42 = vld [vmem:[#allocation10 + $0xd4] ss:$8 sps:$4 sm:$0xff]  }
 0x240   : > { %v666_v50 = vrot.slane %v665_v46, 2 }
 0x241   : > { %v661_v52 = vadd.f32 %v660_v48, %v659_v45  ;;  %v3340_v45 = vld [vmem:[#allocation10 + $0x60] ss:$8 sps:$4 sm:$0xff]  }
 0x242   : > { %v667_v54 = vadd.f32 %v666_v50, %v665_v46  ;;  %v3345_v46 = vld [vmem:[#allocation10 + $0x164] ss:$8 sps:$4 sm:$0xff]   ;;  %v3343_v48 = vld [vmem:[#allocation10 + $0x160] ss:$8 sps:$4 sm:$0xff]   ;;  %1036 = vmatpush1.bf16.msra.mxu0 %v3340_v45  ;;  %v3346_v50 = vld [vmem:[#allocation10 + $0x70] ss:$8 sps:$4 sm:$0xff]  }
 0x243   : > { %v662_v56 = vrot.slane %v661_v52, 1  ;;  %v3387_v45 = vld [vmem:[#allocation10 + $0x1d4] ss:$8 sps:$4 sm:$0xff]  }
 0x244   : > { %v668_v15 = vrot.slane %v667_v54, 1 }
 0x245   : > { %v663_v43 = vadd.f32 %v662_v56, %v661_v52  ;;  %v3348_v52 = vld [vmem:[#allocation10 + $0x74] ss:$8 sps:$4 sm:$0xff]  }
 0x246   : > { %v669_v57 = vadd.f32 %v668_v15, %v667_v54  ;;  %v3349_v54 = vld [vmem:[#allocation10 + $0x170] ss:$8 sps:$4 sm:$0xff]   ;;  %v3351_v56 = vld [vmem:[#allocation10 + $0x174] ss:$8 sps:$4 sm:$0xff]   ;;  %v3354_v15 = vld [vmem:[#allocation10 + $0x84] ss:$8 sps:$4 sm:$0xff]   ;;  %1037 = vmatprep.subr.bf16.mxu0 %v3348_v52 }
 0x247   : > { %1038 = vmatpush1.bf16.msra.mxu0 %v3346_v50  ;;  %v3390_v50 = vld [vmem:[#allocation10 + $0xe4] ss:$8 sps:$4 sm:$0xff]  }
 0x248   : > { %734 = vmatprep.mubr.f32.mxu1 %v669_v57  ;;  %v3357_v57 = vld [vmem:[#allocation10 + $0x184] ss:$8 sps:$4 sm:$0xff]   ;;  %1039 = vmatprep.subr.bf16.mxu0 %v3354_v15  ;;  %v3396_v15 = vld [vmem:[#allocation10 + $0xf4] ss:$8 sps:$4 sm:$0xff]  }
 0x249   : > { %735 = vmatmul.mubr.f32.vlgmr.msra.gmra.mrb[0].mxu1 %v663_v43  ;;  %v3355_v43 = vld [vmem:[#allocation10 + $0x180] ss:$8 sps:$4 sm:$0xff]   ;;  %v3393_v52 = vld [vmem:[#allocation10 + $0x1e4] ss:$8 sps:$4 sm:$0xff]  }
 0x24a   : > { %1235 = vmatpush1.bf16.msra.mxu1 %v3307_v61  ;;  %v3352_v61 = vld [vmem:[#allocation10 + $0x80] ss:$8 sps:$4 sm:$0xff]  }
 0x24b   : > { %1236 = vmatprep.subr.bf16.mxu1 %v3315_v0  ;;  %v3360_v0 = vld [vmem:[#allocation10 + $0x94] ss:$8 sps:$4 sm:$0xff]   ;;  %1040 = vmatpush1.bf16.msra.mxu0 %v3352_v61  ;;  %v3394_v61 = vld [vmem:[#allocation10 + $0xf0] ss:$8 sps:$4 sm:$0xff]  }
 0x24c   : > { %1041 = vmatprep.subr.bf16.mxu0 %v3360_v0  ;;  %v3402_v0 = vld [vmem:[#allocation10 + $0x204] ss:$8 sps:$4 sm:$0xff]  }
 0x24e   : > { %1237 = vmatpush1.bf16.msra.mxu1 %v3313_v1  ;;  %v3363_v1 = vld [vmem:[#allocation10 + $0x194] ss:$8 sps:$4 sm:$0xff]  }
 0x24f   : > { %1238 = vmatprep.subr.bf16.mxu1 %v3321_v2  ;;  %v3358_v2 = vld [vmem:[#allocation10 + $0x90] ss:$8 sps:$4 sm:$0xff]  }
 0x250   : > { %1042 = vmatpush1.bf16.msra.mxu0 %v3358_v2 }
 0x251   : > { %1043 = vmatprep.subr.bf16.mxu0 %v3366_v6 }
 0x252   : > { %1239 = vmatpush1.bf16.msra.mxu1 %v3319_v5  ;;  %v3361_v5 = vld [vmem:[#allocation10 + $0x190] ss:$8 sps:$4 sm:$0xff]  }
 0x253   : > { %1240 = vmatprep.subr.bf16.mxu1 %v3327_v11  ;;  %v3364_v11 = vld [vmem:[#allocation10 + $0xa0] ss:$8 sps:$4 sm:$0xff]  }
 0x254   : > { %1044 = vmatpush1.bf16.msra.mxu0 %v3364_v11  ;;  %v4558_v11 = vsub.s32 1, %v4539_v21 }
 0x255   : > { %1045 = vmatprep.subr.bf16.mxu0 %v3372_v17  ;;  %v562_v17 = vld [vmem:[#allocation8] sm:$0x3] }
 0x256   : > { %1241 = vmatpush1.bf16.msra.mxu1 %v3325_v16  ;;  %v3367_v16 = vld [vmem:[#allocation10 + $0x1a0] ss:$8 sps:$4 sm:$0xff]  }
 0x257   : > { %1242 = vmatprep.subr.bf16.mxu1 %v3333_v27  ;;  %v3370_v27 = vld [vmem:[#allocation10 + $0xb0] ss:$8 sps:$4 sm:$0xff]  }
 0x258   : > { %1046 = vmatpush1.bf16.msra.mxu0 %v3370_v27 }
 0x259   : > { %1047 = vmatprep.subr.bf16.mxu0 %v3378_v30 }
 0x25a   : > { %1243 = vmatpush1.bf16.msra.mxu1 %v3331_v28  ;;  %v3373_v28 = vld [vmem:[#allocation10 + $0x1b0] ss:$8 sps:$4 sm:$0xff]  }
 0x25b   : > { %1244 = vmatprep.subr.bf16.mxu1 %v3339_v38  ;;  %v3376_v38 = vld [vmem:[#allocation10 + $0xc0] ss:$8 sps:$4 sm:$0xff]  }
 0x25c   : > { %1048 = vmatpush1.bf16.msra.mxu0 %v3376_v38  ;;  %v770_v38 = vrot.slane %v562_v17, %v4542_v22 }
 0x25d   : > { %1049 = vmatprep.subr.bf16.mxu0 %v3384_v42 }
 0x25e   : > { %1245 = vmatpush1.bf16.msra.mxu1 %v3337_v41  ;;  %v3379_v41 = vld [vmem:[#allocation10 + $0x1c0] ss:$8 sps:$4 sm:$0xff]  }
 0x25f   : > { %1246 = vmatprep.subr.bf16.mxu1 %v3345_v46  ;;  %v3382_v46 = vld [vmem:[#allocation10 + $0xd0] ss:$8 sps:$4 sm:$0xff]  }
 0x260   : > { %1050 = vmatpush1.bf16.msra.mxu0 %v3382_v46 }
 0x261   : > { %1051 = vmatprep.subr.bf16.mxu0 %v3390_v50 }
 0x262   : > { %1247 = vmatpush1.bf16.msra.mxu1 %v3343_v48  ;;  %v3385_v48 = vld [vmem:[#allocation10 + $0x1d0] ss:$8 sps:$4 sm:$0xff]  }
 0x263   : > { %1248 = vmatprep.subr.bf16.mxu1 %v3351_v56  ;;  %v3391_v56 = vld [vmem:[#allocation10 + $0x1e0] ss:$8 sps:$4 sm:$0xff]  }
 0x266   : > { %1249 = vmatpush1.bf16.msra.mxu1 %v3349_v54  ;;  %v3388_v54 = vld [vmem:[#allocation10 + $0xe0] ss:$8 sps:$4 sm:$0xff]  }
 0x267   : > { %1250 = vmatprep.subr.bf16.mxu1 %v3357_v57  ;;  %v3399_v57 = vld [vmem:[#allocation10 + $0x1f4] ss:$8 sps:$4 sm:$0xff]   ;;  %1052 = vmatpush1.bf16.msra.mxu0 %v3388_v54 }
 0x268   : > { %1053 = vmatprep.subr.bf16.mxu0 %v3396_v15 }
 0x26a   : > { %1251 = vmatpush1.bf16.msra.mxu1 %v3355_v43  ;;  %v3397_v43 = vld [vmem:[#allocation10 + $0x1f0] ss:$8 sps:$4 sm:$0xff]  }
 0x26b   : > { %1252 = vmatprep.subr.bf16.mxu1 %v3363_v1  ;;  %1054 = vmatpush1.bf16.msra.mxu0 %v3394_v61 }
 0x26c   : > { %1468 = vmatprep.subr.bf16.mxu0 %v3402_v0 }
 0x26e   : > { %1253 = vmatpush1.bf16.msra.mxu1 %v3361_v5 }
 0x26f   : > { %1254 = vmatprep.subr.bf16.mxu1 %v3369_v10  ;;  %v561_v10 = vld [vmem:[#allocation7] sm:$0x3] }
 0x272   : > { %1255 = vmatpush1.bf16.msra.mxu1 %v3367_v16 }
 0x273   : > { %1256 = vmatprep.subr.bf16.mxu1 %v3375_v24 }
 0x276   : > { %1257 = vmatpush1.bf16.msra.mxu1 %v3373_v28  ;;  %v757_v28 = vrot.slane %v561_v10, %v4542_v22 }
 0x277   : > { %1258 = vmatprep.subr.bf16.mxu1 %v3381_v36  ;;  %v761_v36 = vrot.slane %v561_v10, %v4558_v11  ;;  %v3405_v10 = vld [vmem:[#allocation10 + $0x214] ss:$8 sps:$4 sm:$0xff]  }
 0x27a   : > { %1259 = vmatpush1.bf16.msra.mxu1 %v3379_v41 }
 0x27b   : > { %1260 = vmatprep.subr.bf16.mxu1 %v3387_v45  ;;  %v774_v45 = vrot.slane %v562_v17, %v4558_v11  ;;  %v3408_v17 = vld [vmem:[#allocation10 + $0x224] ss:$8 sps:$4 sm:$0xff]  }
 0x27e   : > { %1261 = vmatpush1.bf16.msra.mxu1 %v3385_v48 }
 0x27f   : > { %1262 = vmatprep.subr.bf16.mxu1 %v3393_v52 }
 0x282   : > { %1263 = vmatpush1.bf16.msra.mxu1 %v3391_v56 }
 0x283   : > { %1264 = vmatprep.subr.bf16.mxu1 %v3399_v57 }
 0x286   : > { %1265 = vmatpush1.bf16.msra.mxu1 %v3397_v43 }
 0x287   : > { %3036 = vmatprep.subr.bf16.mxu1 %v4401_v3 }
 0x31c   : > { %v736_v1 = vpop.f32.mrb[0].mxu1 }
 0x31d   : > { %v737_v2 = vadd.f32 1e-05, %v736_v1  ;;  %v738_v5 = vpop.f32.mrb[1].mxu1 }
 0x31e   : > { %v739_v6 = vadd.f32 1e-05, %v738_v5  ;;  %v3400_v5 = vld [vmem:[#allocation10 + $0x200] ss:$8 sps:$4 sm:$0xff]  }
 0x31f   : > { %3592 = vrsqrt.f32 %v737_v2 }
 0x320   : > { %3594 = vrsqrt.f32 %v739_v6 }
 0x329   : > { %v3593_v16 = vpop.eup %3592 }
 0x32a   : > { %v3595_v24 = vpop.eup %3594  ;;  %v746_v27 = vrot.slane %v3593_v16, %v4542_v22  ;;  %v3403_v16 = vld [vmem:[#allocation10 + $0x210] ss:$8 sps:$4 sm:$0xff]  }
 0x32b   : > { %v750_v30 = vrot.slane %v3595_v24, %v4542_v22  ;;  %v3406_v24 = vld [vmem:[#allocation10 + $0x220] ss:$8 sps:$4 sm:$0xff]  }
 0x32c   : > { %v751_v41 = vmul.f32 %v746_v27, %v4547_v33  ;;  %v3411_v27 = vld [vmem:[#allocation10 + $0x234] ss:$8 sps:$4 sm:$0xff]  }
 0x32d   : > { %v752_v42 = vmul.f32 %v750_v30, %v4550_v35  ;;  %v3414_v30 = vld [vmem:[#allocation10 + $0x244] ss:$8 sps:$4 sm:$0xff]  }
 0x32e   : > { %v764_v46 = vmul.f32 %v757_v28, %v751_v41  ;;  %v3409_v28 = vld [vmem:[#allocation10 + $0x230] ss:$8 sps:$4 sm:$0xff]  }
 0x32f   : > { %v765_v48 = vmul.f32 %v761_v36, %v752_v42  ;;  %v3412_v36 = vld [vmem:[#allocation10 + $0x240] ss:$8 sps:$4 sm:$0xff]   ;;  %v3415_v41 = vld [vmem:[#allocation10 + $0x250] ss:$8 sps:$4 sm:$0xff]   ;;  %v3420_v42 = vld [vmem:[#allocation10 + $0x264] ss:$8 sps:$4 sm:$0xff]  }
 0x330   : > { %v777_v50 = vadd.f32 %v770_v38, %v764_v46  ;;  %v3417_v38 = vld [vmem:[#allocation10 + $0x254] ss:$8 sps:$4 sm:$0xff]  }
 0x331   : > { %v778_v52 = vadd.f32 %v774_v45, %v765_v48  ;;  %v3418_v45 = vld [vmem:[#allocation10 + $0x260] ss:$8 sps:$4 sm:$0xff]   ;;  %v3423_v46 = vld [vmem:[#allocation10 + $0x274] ss:$8 sps:$4 sm:$0xff]   ;;  %v3421_v48 = vld [vmem:[#allocation10 + $0x270] ss:$8 sps:$4 sm:$0xff]  }
 0x332   : > { %v2702_v54 = vmul.f32 -1.442695, %v777_v50 }
 0x333   : > { %v2703_v56 = vmul.f32 -1.442695, %v778_v52 }
 0x334   : > { %3596 = vpow2.f32 %v2702_v54  ;;  %v3429_v54 = vld [vmem:[#allocation10 + $0x294] ss:$8 sps:$4 sm:$0xff]  }
 0x335   : > { %3598 = vpow2.f32 %v2703_v56  ;;  %v3427_v56 = vld [vmem:[#allocation10 + $0x290] ss:$8 sps:$4 sm:$0xff]  }
 0x33e   : > { %v3597_v15 = vpop.eup %3596 }
 0x33f   : > { %v3599_v57 = vpop.eup %3598  ;;  %v785_v61 = vadd.f32 1.0, %v3597_v15  ;;  %v3432_v15 = vld [vmem:[#allocation10 + $0x2a4] ss:$8 sps:$4 sm:$0xff]  }
 0x340   : > { %v786_v43 = vadd.f32 1.0, %v3599_v57  ;;  %v3430_v57 = vld [vmem:[#allocation10 + $0x2a0] ss:$8 sps:$4 sm:$0xff]  }
 0x341   : > { %3600 = vrcp.f32 %v785_v61  ;;  %v3435_v61 = vld [vmem:[#allocation10 + $0x2b4] ss:$8 sps:$4 sm:$0xff]  }
 0x342   : > { %3602 = vrcp.f32 %v786_v43  ;;  %v3433_v43 = vld [vmem:[#allocation10 + $0x2b0] ss:$8 sps:$4 sm:$0xff]  }
 0x34b   : > { %v3601_v0 = vpop.eup %3600 }
 0x34c   : > { %v3603_v33 = vpop.eup %3602  ;;  %v791_v1 = vmul.f32 %v3601_v0, %v777_v50  ;;  %v3426_v50 = vld [vmem:[#allocation10 + $0x284] ss:$8 sps:$4 sm:$0xff]  }
 0x34d   : > { %v792_v35 = vmul.f32 %v3603_v33, %v778_v52  ;;  %v3424_v52 = vld [vmem:[#allocation10 + $0x280] ss:$8 sps:$4 sm:$0xff]   ;;  %v3438_v0 = vld [vmem:[#allocation10 + $0x2c4] ss:$8 sps:$4 sm:$0xff]  }
 0x34e   : > { %v4568_v6 = vpack.c.bf16 %v791_v1, %v791_v1  ;;  %v3436_v33 = vld [vmem:[#allocation10 + $0x2c0] ss:$8 sps:$4 sm:$0xff]   ;;  %v3441_v1 = vld [vmem:[#allocation10 + $0x2d4] ss:$8 sps:$4 sm:$0xff]  }
 0x34f   : > { %v794_v2 = vpack.c.bf16 %v792_v35, %v792_v35  ;;  %v3439_v35 = vld [vmem:[#allocation10 + $0x2d0] ss:$8 sps:$4 sm:$0xff]  }
 0x351   : > { %1055 = vmatprep.mubr.bf16.mxu0 %v794_v2  ;;  %1266 = vmatprep.mubr.bf16.mxu1 %v794_v2 }
 0x352   : > { %1056 = vmatmul.mubr.bf16.vlgmr.msra.gmra.mrb[4].mxu0 %v4568_v6  ;;  %1267 = vmatmul.mubr.bf16.vlgmr.msra.gmra.mrb[4].mxu1 %v4568_v6 }
 0x353   : > { %1469 = vmatpush1.bf16.msra.mxu0 %v3400_v5  ;;  %1500 = vmatprep.mubr.bf16.mxu0 %v794_v2  ;;  %v3444_v2 = vld [vmem:[#allocation10 + $0x2e4] ss:$8 sps:$4 sm:$0xff]   ;;  %v3442_v5 = vld [vmem:[#allocation10 + $0x2e0] ss:$8 sps:$4 sm:$0xff]  }
 0x354   : > { %1470 = vmatprep.subr.bf16.mxu0 %v3405_v10  ;;  %3038 = vmatpush1.bf16.msra.mxu1 %v4403_v7  ;;  %v3447_v10 = vld [vmem:[#allocation10 + $0x2f4] ss:$8 sps:$4 sm:$0xff]  }
 0x355   : > { %3040 = vmatprep.subr.bf16.mxu1 %v4405_v8 }
 0x357   : > { %1471 = vmatpush1.bf16.msra.mxu0 %v3403_v16  ;;  %v3445_v16 = vld [vmem:[#allocation10 + $0x2f0] ss:$8 sps:$4 sm:$0xff]  }
 0x358   : > { %1472 = vmatprep.subr.bf16.mxu0 %v3408_v17  ;;  %3042 = vmatpush1.bf16.msra.mxu1 %v4410_v13 }
 0x359   : > { %3044 = vmatprep.subr.bf16.mxu1 %v4414_v14 }
 0x35b   : > { %1473 = vmatpush1.bf16.msra.mxu0 %v3406_v24 }
 0x35c   : > { %1474 = vmatprep.subr.bf16.mxu0 %v3411_v27  ;;  %3046 = vmatpush1.bf16.msra.mxu1 %v4418_v19 }
 0x35d   : > { %3048 = vmatprep.subr.bf16.mxu1 %v4422_v20 }
 0x35f   : > { %1475 = vmatpush1.bf16.msra.mxu0 %v3409_v28 }
 0x360   : > { %1476 = vmatprep.subr.bf16.mxu0 %v3414_v30  ;;  %3050 = vmatpush1.bf16.msra.mxu1 %v4426_v25 }
 0x361   : > { %3052 = vmatprep.subr.bf16.mxu1 %v4430_v26 }
 0x363   : > { %1477 = vmatpush1.bf16.msra.mxu0 %v3412_v36 }
 0x364   : > { %1478 = vmatprep.subr.bf16.mxu0 %v3417_v38  ;;  %3054 = vmatpush1.bf16.msra.mxu1 %v4434_v31 }
 0x365   : > { %3056 = vmatprep.subr.bf16.mxu1 %v4438_v32 }
 0x367   : > { %1479 = vmatpush1.bf16.msra.mxu0 %v3415_v41 }
 0x368   : > { %1480 = vmatprep.subr.bf16.mxu0 %v3420_v42  ;;  %3058 = vmatpush1.bf16.msra.mxu1 %v4442_v37 }
 0x369   : > { %3060 = vmatprep.subr.bf16.mxu1 %v4446_v40 }
 0x36b   : > { %1481 = vmatpush1.bf16.msra.mxu0 %v3418_v45  ;;  %v3448_v45 = vld [vmem:[#allocation16] ss:$8 sps:$4 sm:$0xff]  }
 0x36c   : > { %1482 = vmatprep.subr.bf16.mxu0 %v3423_v46  ;;  %3062 = vmatpush1.bf16.msra.mxu1 %v4454_v47  ;;  %v3450_v46 = vld [vmem:[#allocation16 + $0x4] ss:$8 sps:$4 sm:$0xff]  }
 0x36d   : > { %3064 = vmatprep.subr.bf16.mxu1 %v4459_v51 }
 0x36f   : > { %1483 = vmatpush1.bf16.msra.mxu0 %v3421_v48  ;;  %v3453_v48 = vld [vmem:[#allocation16 + $0x104] ss:$8 sps:$4 sm:$0xff]  }
 0x370   : > { %1484 = vmatprep.subr.bf16.mxu0 %v3426_v50  ;;  %3066 = vmatpush1.bf16.msra.mxu1 %v4463_v55  ;;  %v3456_v50 = vld [vmem:[#allocation16 + $0x14] ss:$8 sps:$4 sm:$0xff]  }
 0x371   : > { %3068 = vmatprep.subr.bf16.mxu1 %v4467_v59 }
 0x373   : > { %1485 = vmatpush1.bf16.msra.mxu0 %v3424_v52  ;;  %v3454_v52 = vld [vmem:[#allocation16 + $0x10] ss:$8 sps:$4 sm:$0xff]  }
 0x374   : > { %1486 = vmatprep.subr.bf16.mxu0 %v3429_v54  ;;  %3070 = vmatpush1.bf16.msra.mxu1 %v4471_v63  ;;  %v3462_v54 = vld [vmem:[#allocation16 + $0x24] ss:$8 sps:$4 sm:$0xff]  }
 0x375   : > { %3072 = vmatprep.subr.bf16.mxu1 %v4475_v4 }
 0x377   : > { %1487 = vmatpush1.bf16.msra.mxu0 %v3427_v56  ;;  %v3460_v56 = vld [vmem:[#allocation16 + $0x20] ss:$8 sps:$4 sm:$0xff]  }
 0x378   : > { %1488 = vmatprep.subr.bf16.mxu0 %v3432_v15  ;;  %3074 = vmatpush1.bf16.msra.mxu1 %v4479_v9 }
 0x379   : > { %3076 = vmatprep.subr.bf16.mxu1 %v4483_v12 }
 0x37b   : > { %1489 = vmatpush1.bf16.msra.mxu0 %v3430_v57 }
 0x37c   : > { %1490 = vmatprep.subr.bf16.mxu0 %v3435_v61  ;;  %3078 = vmatpush1.bf16.msra.mxu1 %v4490_v18 }
 0x37d   : > { %3080 = vmatprep.subr.bf16.mxu1 %v4494_v23 }
 0x37f   : > { %1491 = vmatpush1.bf16.msra.mxu0 %v3433_v43 }
 0x380   : > { %1492 = vmatprep.subr.bf16.mxu0 %v3438_v0  ;;  %3082 = vmatpush1.bf16.msra.mxu1 %v4499_v29 }
 0x381   : > { %3084 = vmatprep.subr.bf16.mxu1 %v4503_v34 }
 0x383   : > { %1493 = vmatpush1.bf16.msra.mxu0 %v3436_v33 }
 0x384   : > { %1494 = vmatprep.subr.bf16.mxu0 %v3441_v1  ;;  %3086 = vmatpush1.bf16.msra.mxu1 %v4508_v39 }
 0x385   : > { %3088 = vmatprep.subr.bf16.mxu1 %v4512_v44 }
 0x387   : > { %1495 = vmatpush1.bf16.msra.mxu0 %v3439_v35 }
 0x388   : > { %1496 = vmatprep.subr.bf16.mxu0 %v3444_v2  ;;  %3090 = vmatpush1.bf16.msra.mxu1 %v4516_v49 }
 0x389   : > { %3092 = vmatprep.subr.bf16.mxu1 %v4520_v53 }
 0x38b   : > { %1497 = vmatpush1.bf16.msra.mxu0 %v3442_v5 }
 0x38c   : > { %1498 = vmatprep.subr.bf16.mxu0 %v3447_v10  ;;  %3094 = vmatpush1.bf16.msra.mxu1 %v4524_v58 }
 0x38d   : > { %3096 = vmatprep.subr.bf16.mxu1 %v4528_v60 }
 0x38f   : > { %1499 = vmatpush1.bf16.msra.mxu0 %v3445_v16 }
 0x390   : > { %3098 = vmatpush1.bf16.msra.mxu1 %v4532_v62  ;;  %3100 = vmatprep.subr.bf16.mxu0 %v4401_v3  ;;  %v4637_v3 = vadd.s32 4294967295, %v4539_v21 }
 0x391   : > { %1994 = vmatprep.subr.bf16.mxu1 %v3450_v46  ;;  %v3513_v46 = vld [vmem:[#allocation16 + $0x1a4] ss:$8 sps:$4 sm:$0xff]  }
 0x392   : > { %1501 = vmatmul.mubr.bf16.vlgmr.msra.gmra.mrb[8].mxu0 %v4568_v6  ;;  %vm1067_vm0 = vcmp.ge.s32.totalorder %v4637_v3, 0 }
 0x393   : > { %3102 = vmatpush1.bf16.msra.mxu0 %v4403_v7 }
 0x394   : > { %3104 = vmatprep.subr.bf16.mxu0 %v4405_v8 }
 0x397   : > { %3106 = vmatpush1.bf16.msra.mxu0 %v4410_v13 }
 0x398   : > { %3108 = vmatprep.subr.bf16.mxu0 %v4414_v14 }
 0x39b   : > { %3110 = vmatpush1.bf16.msra.mxu0 %v4418_v19 }
 0x39c   : > { %3112 = vmatprep.subr.bf16.mxu0 %v4422_v20 }
 0x39f   : > { %3114 = vmatpush1.bf16.msra.mxu0 %v4426_v25 }
 0x3a0   : > { %3116 = vmatprep.subr.bf16.mxu0 %v4430_v26 }
 0x3a3   : > { %3118 = vmatpush1.bf16.msra.mxu0 %v4434_v31 }
 0x3a4   : > { %3120 = vmatprep.subr.bf16.mxu0 %v4438_v32 }
 0x3a7   : > { %3122 = vmatpush1.bf16.msra.mxu0 %v4442_v37 }
 0x3a8   : > { %3124 = vmatprep.subr.bf16.mxu0 %v4446_v40 }
 0x3ab   : > { %3126 = vmatpush1.bf16.msra.mxu0 %v4454_v47 }
 0x3ac   : > { %3128 = vmatprep.subr.bf16.mxu0 %v4459_v51 }
 0x3af   : > { %3130 = vmatpush1.bf16.msra.mxu0 %v4463_v55  ;;  %v4645_v55 = vadd.s32 1, %v4539_v21 }
 0x3b0   : > { %3132 = vmatprep.subr.bf16.mxu0 %v4467_v59  ;;  %v795_v59 = vld [vmem:[#allocation11] sm:$0x3] }
 0x3b1   : > { %vm1513_vm1 = vcmp.lt.s32.totalorder %v4645_v55, 8 }
 0x3b3   : > { %3134 = vmatpush1.bf16.msra.mxu0 %v4471_v63 }
 0x3b4   : > { %3136 = vmatprep.subr.bf16.mxu0 %v4475_v4 }
 0x3b7   : > { %3138 = vmatpush1.bf16.msra.mxu0 %v4479_v9 }
 0x3b8   : > { %3140 = vmatprep.subr.bf16.mxu0 %v4483_v12  ;;  %v1525_v12 = vrot.slane %v795_v59, %v4542_v22 }
 0x3bb   : > { %3142 = vmatpush1.bf16.msra.mxu0 %v4490_v18 }
 0x3bc   : > { %3144 = vmatprep.subr.bf16.mxu0 %v4494_v23 }
 0x3bf   : > { %3146 = vmatpush1.bf16.msra.mxu0 %v4499_v29 }
 0x3c0   : > { %3148 = vmatprep.subr.bf16.mxu0 %v4503_v34  ;;  %v1529_v34 = vrot.slane %v795_v59, %v4558_v11  ;;  %v3466_v59 = vld [vmem:[#allocation16 + $0x30] ss:$8 sps:$4 sm:$0xff]  }
 0x3c3   : > { %3150 = vmatpush1.bf16.msra.mxu0 %v4508_v39 }
 0x3c4   : > { %3152 = vmatprep.subr.bf16.mxu0 %v4512_v44 }
 0x3c7   : > { %3154 = vmatpush1.bf16.msra.mxu0 %v4516_v49 }
 0x3c8   : > { %3156 = vmatprep.subr.bf16.mxu0 %v4520_v53 }
 0x3cb   : > { %3158 = vmatpush1.bf16.msra.mxu0 %v4524_v58 }
 0x3cc   : > { %3160 = vmatprep.subr.bf16.mxu0 %v4528_v60 }
 0x3cf   : > { %3162 = vmatpush1.bf16.msra.mxu0 %v4532_v62 }
 0x3d0   : > { %2199 = vmatprep.subr.bf16.mxu0 %v3453_v48  ;;  %v3508_v48 = vld [vmem:[#allocation16 + $0xa0] ss:$8 sps:$4 sm:$0xff]  }
 0x425   : > { %v1057_v7 = vpop.f32.mrb[4].mxu0  ;;  %v1268_v8 = vpop.f32.mrb[4].mxu1 }
 0x426   : > { %v1064_v13 = vrot.slane %v1057_v7, 7  ;;  %v1059_v14 = vpop.f32.mrb[5].mxu0  ;;  %v1270_v19 = vpop.f32.mrb[5].mxu1 }
 0x427   : > { %v1065_v20 = vrot.slane %v1059_v14, 7  ;;  %v1061_v25 = vpop.f32.mrb[6].mxu0  ;;  %v1272_v26 = vpop.f32.mrb[6].mxu1 }
 0x428   : > { %v1072_v31 = vsel %vm1067_vm0, %v1064_v13, 0.0  ;;  %v1062_v32 = vpop.f32.mrb[7].mxu0  ;;  %v1273_v37 = vpop.f32.mrb[7].mxu1  ;;  %v3451_v26 = vld [vmem:[#allocation16 + $0x100] ss:$8 sps:$4 sm:$0xff]  }
 0x429   : > { %v1269_v40 = vadd.f32 %v1268_v8, %v1072_v31  ;;  %v1073_v47 = vsel %vm1067_vm0, %v1065_v20, 0.0  ;;  %v3459_v32 = vld [vmem:[#allocation16 + $0x114] ss:$8 sps:$4 sm:$0xff]   ;;  %v3457_v37 = vld [vmem:[#allocation16 + $0x110] ss:$8 sps:$4 sm:$0xff]  }
 0x42a   : > { %v1271_v51 = vadd.f32 %v1270_v19, %v1073_v47  ;;  %v3463_v47 = vld [vmem:[#allocation16 + $0x120] ss:$8 sps:$4 sm:$0xff]  }
 0x465   : > { %v1502_v63 = vpop.f32.mrb[8].mxu0 }
 0x466   : > { %v1509_v4 = vrot.slane %v1502_v63, 1  ;;  %v1504_v9 = vpop.f32.mrb[9].mxu0  ;;  %v3471_v63 = vld [vmem:[#allocation16 + $0x134] ss:$8 sps:$4 sm:$0xff]  }
 0x467   : > { %v1510_v18 = vrot.slane %v1504_v9, 1  ;;  %v1506_v23 = vpop.f32.mrb[10].mxu0  ;;  %v3474_v9 = vld [vmem:[#allocation16 + $0x44] ss:$8 sps:$4 sm:$0xff]  }
 0x468   : > { %v1517_v29 = vsel %vm1513_vm1, %v1509_v4, 0.0  ;;  %v1507_v39 = vpop.f32.mrb[11].mxu0  ;;  %v3469_v4 = vld [vmem:[#allocation16 + $0x130] ss:$8 sps:$4 sm:$0xff]   ;;  %v3475_v23 = vld [vmem:[#allocation16 + $0x140] ss:$8 sps:$4 sm:$0xff]  }
 0x469   : > { %v1519_v44 = vadd.f32 %v1517_v29, %v1269_v40  ;;  %v1518_v49 = vsel %vm1513_vm1, %v1510_v18, 0.0  ;;  %v3465_v40 = vld [vmem:[#allocation16 + $0x124] ss:$8 sps:$4 sm:$0xff]   ;;  %v3480_v29 = vld [vmem:[#allocation16 + $0x54] ss:$8 sps:$4 sm:$0xff]  }
 0x46a   : > { %v1520_v53 = vadd.f32 %v1518_v49, %v1271_v51  ;;  %v3468_v51 = vld [vmem:[#allocation16 + $0x34] ss:$8 sps:$4 sm:$0xff]   ;;  %v3477_v18 = vld [vmem:[#allocation16 + $0x144] ss:$8 sps:$4 sm:$0xff]  }
 0x46b   : > { %v1532_v58 = vadd.f32 %v1525_v12, %v1519_v44  ;;  %v3472_v12 = vld [vmem:[#allocation16 + $0x40] ss:$8 sps:$4 sm:$0xff]   ;;  %v3483_v39 = vld [vmem:[#allocation16 + $0x154] ss:$8 sps:$4 sm:$0xff]   ;;  %v3481_v44 = vld [vmem:[#allocation16 + $0x150] ss:$8 sps:$4 sm:$0xff]  }
 0x46c   : > { %v1533_v60 = vadd.f32 %v1529_v34, %v1520_v53  ;;  %v3478_v34 = vld [vmem:[#allocation16 + $0x50] ss:$8 sps:$4 sm:$0xff]   ;;  %v3486_v49 = vld [vmem:[#allocation16 + $0x64] ss:$8 sps:$4 sm:$0xff]   ;;  %v3484_v53 = vld [vmem:[#allocation16 + $0x60] ss:$8 sps:$4 sm:$0xff]  }
 0x46d   : > { %v1536_v62 = vrot.slane %v1532_v58, 4 }
 0x46e   : > { %v1542_v21 = vrot.slane %v1533_v60, 4 }
 0x46f   : > { %v1537_v6 = vadd.f32 %v1536_v62, %v1532_v58  ;;  %v3490_v62 = vld [vmem:[#allocation16 + $0x70] ss:$8 sps:$4 sm:$0xff]  }
 0x470   : > { %v1543_v17 = vadd.f32 %v1542_v21, %v1533_v60  ;;  %v3492_v21 = vld [vmem:[#allocation16 + $0x74] ss:$8 sps:$4 sm:$0xff]  }
 0x471   : > { %v1538_v24 = vrot.slane %v1537_v6, 2 }
 0x472   : > { %v1544_v27 = vrot.slane %v1543_v17, 2 }
 0x473   : > { %v1539_v28 = vadd.f32 %v1538_v24, %v1537_v6  ;;  %v3493_v6 = vld [vmem:[#allocation16 + $0x170] ss:$8 sps:$4 sm:$0xff]   ;;  %v3498_v24 = vld [vmem:[#allocation16 + $0x84] ss:$8 sps:$4 sm:$0xff]  }
 0x474   : > { %v1545_v30 = vadd.f32 %v1544_v27, %v1543_v17  ;;  %v3495_v17 = vld [vmem:[#allocation16 + $0x174] ss:$8 sps:$4 sm:$0xff]   ;;  %v3501_v27 = vld [vmem:[#allocation16 + $0x184] ss:$8 sps:$4 sm:$0xff]  }
 0x475   : > { %v1540_v36 = vrot.slane %v1539_v28, 1 }
 0x476   : > { %v1546_v38 = vrot.slane %v1545_v30, 1 }
 0x477   : > { %v1541_v42 = vadd.f32 %v1540_v36, %v1539_v28  ;;  %v3496_v28 = vld [vmem:[#allocation16 + $0x80] ss:$8 sps:$4 sm:$0xff]   ;;  %v3504_v36 = vld [vmem:[#allocation16 + $0x94] ss:$8 sps:$4 sm:$0xff]  }
 0x478   : > { %v1547_v41 = vadd.f32 %v1546_v38, %v1545_v30  ;;  %v3499_v30 = vld [vmem:[#allocation16 + $0x180] ss:$8 sps:$4 sm:$0xff]   ;;  %v3507_v38 = vld [vmem:[#allocation16 + $0x194] ss:$8 sps:$4 sm:$0xff]  }
 0x47a   : > { %1612 = vmatprep.mubr.f32.mxu1 %v1547_v41  ;;  %v3502_v41 = vld [vmem:[#allocation16 + $0x90] ss:$8 sps:$4 sm:$0xff]  }
 0x47b   : > { %1613 = vmatmul.mubr.f32.vlgmr.msra.gmra.mrb[2].mxu1 %v1541_v42  ;;  %v3505_v42 = vld [vmem:[#allocation16 + $0x190] ss:$8 sps:$4 sm:$0xff]  }
 0x47c   : > { %1995 = vmatpush1.bf16.msra.mxu1 %v3448_v45  ;;  %v3510_v45 = vld [vmem:[#allocation16 + $0xa4] ss:$8 sps:$4 sm:$0xff]  }
 0x47d   : > { %1996 = vmatprep.subr.bf16.mxu1 %v3456_v50  ;;  %v3511_v50 = vld [vmem:[#allocation16 + $0x1a0] ss:$8 sps:$4 sm:$0xff]  }
 0x480   : > { %1997 = vmatpush1.bf16.msra.mxu1 %v3454_v52  ;;  %v3516_v52 = vld [vmem:[#allocation16 + $0xb4] ss:$8 sps:$4 sm:$0xff]  }
 0x481   : > { %1998 = vmatprep.subr.bf16.mxu1 %v3462_v54  ;;  %v3519_v54 = vld [vmem:[#allocation16 + $0x1b4] ss:$8 sps:$4 sm:$0xff]  }
 0x484   : > { %1999 = vmatpush1.bf16.msra.mxu1 %v3460_v56  ;;  %v3514_v56 = vld [vmem:[#allocation16 + $0xb0] ss:$8 sps:$4 sm:$0xff]  }
 0x485   : > { %2000 = vmatprep.subr.bf16.mxu1 %v3468_v51 }
 0x488   : > { %2001 = vmatpush1.bf16.msra.mxu1 %v3466_v59  ;;  %v1535_v59 = vld [vmem:[#allocation14] sm:$0x3] }
 0x489   : > { %2002 = vmatprep.subr.bf16.mxu1 %v3474_v9 }
 0x48c   : > { %2003 = vmatpush1.bf16.msra.mxu1 %v3472_v12 }
 0x48d   : > { %2004 = vmatprep.subr.bf16.mxu1 %v3480_v29 }
 0x490   : > { %2005 = vmatpush1.bf16.msra.mxu1 %v3478_v34 }
 0x491   : > { %2006 = vmatprep.subr.bf16.mxu1 %v3486_v49 }
 0x494   : > { %2007 = vmatpush1.bf16.msra.mxu1 %v3484_v53 }
 0x495   : > { %2008 = vmatprep.subr.bf16.mxu1 %v3492_v21 }
 0x498   : > { %2009 = vmatpush1.bf16.msra.mxu1 %v3490_v62 }
 0x499   : > { %2010 = vmatprep.subr.bf16.mxu1 %v3498_v24 }
 0x49c   : > { %2011 = vmatpush1.bf16.msra.mxu1 %v3496_v28 }
 0x49d   : > { %2012 = vmatprep.subr.bf16.mxu1 %v3504_v36  ;;  %v3544_v36 = vld [vmem:[#allocation16 + $0x200] ss:$8 sps:$4 sm:$0xff]  }
 0x4a0   : > { %2013 = vmatpush1.bf16.msra.mxu1 %v3502_v41  ;;  %v3549_v41 = vld [vmem:[#allocation16 + $0x214] ss:$8 sps:$4 sm:$0xff]  }
 0x4a1   : > { %2014 = vmatprep.subr.bf16.mxu1 %v3510_v45  ;;  %v3552_v45 = vld [vmem:[#allocation16 + $0x224] ss:$8 sps:$4 sm:$0xff]  }
 0x4a4   : > { %2015 = vmatpush1.bf16.msra.mxu1 %v3508_v48  ;;  %v3555_v48 = vld [vmem:[#allocation16 + $0x234] ss:$8 sps:$4 sm:$0xff]  }
 0x4a5   : > { %2016 = vmatprep.subr.bf16.mxu1 %v3516_v52  ;;  %v3558_v52 = vld [vmem:[#allocation16 + $0x244] ss:$8 sps:$4 sm:$0xff]  }
 0x4a8   : > { %2017 = vmatpush1.bf16.msra.mxu1 %v3514_v56  ;;  %v3561_v56 = vld [vmem:[#allocation16 + $0x254] ss:$8 sps:$4 sm:$0xff]  }
 0x54e   : > { %v1614_v15 = vpop.f32.mrb[2].mxu1 }
 0x54f   : > { %v1622_v57 = vrot.slane %v1614_v15, %v4542_v22  ;;  %v1616_v61 = vpop.f32.mrb[3].mxu1  ;;  %v3517_v15 = vld [vmem:[#allocation16 + $0x1b0] ss:$8 sps:$4 sm:$0xff]  }
 0x550   : > { %v1626_v43 = vrot.slane %v1616_v61, %v4542_v22  ;;  %v3525_v61 = vld [vmem:[#allocation16 + $0x1c4] ss:$8 sps:$4 sm:$0xff]  }
 0x551   : > { %v4656_v0 = vsub.f32 %v1532_v58, %v1622_v57  ;;  %v3489_v58 = vld [vmem:[#allocation16 + $0x164] ss:$8 sps:$4 sm:$0xff]  }
 0x552   : > { %v4658_v33 = vsub.f32 %v1533_v60, %v1626_v43  ;;  %v3487_v60 = vld [vmem:[#allocation16 + $0x160] ss:$8 sps:$4 sm:$0xff]   ;;  %v3522_v57 = vld [vmem:[#allocation16 + $0xc4] ss:$8 sps:$4 sm:$0xff]  }
 0x553   : > { %v1629_v1 = vmul.f32 %v4656_v0, %v4656_v0  ;;  %v3520_v43 = vld [vmem:[#allocation16 + $0xc0] ss:$8 sps:$4 sm:$0xff]   ;;  %2018 = vmatprep.subr.bf16.mxu1 %v3522_v57  ;;  %v3564_v57 = vld [vmem:[#allocation16 + $0x264] ss:$8 sps:$4 sm:$0xff]  }
 0x554   : > { %v1630_v35 = vmul.f32 %v4658_v33, %v4658_v33  ;;  %2019 = vmatpush1.bf16.msra.mxu1 %v3520_v43  ;;  %v3567_v43 = vld [vmem:[#allocation16 + $0x274] ss:$8 sps:$4 sm:$0xff]  }
 0x555   : > { %v1631_v2 = vrot.slane %v1629_v1, 4 }
 0x556   : > { %v1637_v5 = vrot.slane %v1630_v35, 4 }
 0x557   : > { %v1632_v10 = vadd.f32 %v1631_v2, %v1629_v1  ;;  %v3523_v1 = vld [vmem:[#allocation16 + $0x1c0] ss:$8 sps:$4 sm:$0xff]   ;;  %v3531_v2 = vld [vmem:[#allocation16 + $0x1d4] ss:$8 sps:$4 sm:$0xff]  }
 0x558   : > { %v1638_v16 = vadd.f32 %v1637_v5, %v1630_v35  ;;  %v3528_v35 = vld [vmem:[#allocation16 + $0xd4] ss:$8 sps:$4 sm:$0xff]   ;;  %v3526_v5 = vld [vmem:[#allocation16 + $0xd0] ss:$8 sps:$4 sm:$0xff]  }
 0x559   : > { %v1633_v7 = vrot.slane %v1632_v10, 2  ;;  %2020 = vmatprep.subr.bf16.mxu1 %v3528_v35  ;;  %v3570_v35 = vld [vmem:[#allocation16 + $0x284] ss:$8 sps:$4 sm:$0xff]  }
 0x55a   : > { %v1639_v8 = vrot.slane %v1638_v16, 2  ;;  %2021 = vmatpush1.bf16.msra.mxu1 %v3526_v5  ;;  %v3573_v5 = vld [vmem:[#allocation16 + $0x294] ss:$8 sps:$4 sm:$0xff]  }
 0x55b   : > { %v1634_v13 = vadd.f32 %v1633_v7, %v1632_v10  ;;  %v3529_v10 = vld [vmem:[#allocation16 + $0x1d0] ss:$8 sps:$4 sm:$0xff]   ;;  %v3537_v7 = vld [vmem:[#allocation16 + $0x1e4] ss:$8 sps:$4 sm:$0xff]  }
 0x55c   : > { %v1640_v14 = vadd.f32 %v1639_v8, %v1638_v16  ;;  %v3534_v16 = vld [vmem:[#allocation16 + $0xe4] ss:$8 sps:$4 sm:$0xff]   ;;  %v3532_v8 = vld [vmem:[#allocation16 + $0xe0] ss:$8 sps:$4 sm:$0xff]  }
 0x55d   : > { %v1635_v19 = vrot.slane %v1634_v13, 1  ;;  %2022 = vmatprep.subr.bf16.mxu1 %v3534_v16  ;;  %v3576_v16 = vld [vmem:[#allocation16 + $0x2a4] ss:$8 sps:$4 sm:$0xff]  }
 0x55e   : > { %v1641_v20 = vrot.slane %v1640_v14, 1  ;;  %2023 = vmatpush1.bf16.msra.mxu1 %v3532_v8  ;;  %v3579_v8 = vld [vmem:[#allocation16 + $0x2b4] ss:$8 sps:$4 sm:$0xff]  }
 0x55f   : > { %v1636_v31 = vadd.f32 %v1635_v19, %v1634_v13  ;;  %v3535_v13 = vld [vmem:[#allocation16 + $0x1e0] ss:$8 sps:$4 sm:$0xff]   ;;  %v3543_v19 = vld [vmem:[#allocation16 + $0x1f4] ss:$8 sps:$4 sm:$0xff]  }
 0x560   : > { %v1642_v25 = vadd.f32 %v1641_v20, %v1640_v14  ;;  %v3540_v14 = vld [vmem:[#allocation16 + $0xf4] ss:$8 sps:$4 sm:$0xff]   ;;  %v3538_v20 = vld [vmem:[#allocation16 + $0xf0] ss:$8 sps:$4 sm:$0xff]  }
 0x561   : > { %2024 = vmatprep.subr.bf16.mxu1 %v3540_v14  ;;  %v3582_v14 = vld [vmem:[#allocation16 + $0x2c4] ss:$8 sps:$4 sm:$0xff]  }
 0x562   : > { %1707 = vmatprep.mubr.f32.mxu0 %v1642_v25  ;;  %v3541_v25 = vld [vmem:[#allocation16 + $0x1f0] ss:$8 sps:$4 sm:$0xff]   ;;  %2025 = vmatpush1.bf16.msra.mxu1 %v3538_v20  ;;  %v3585_v20 = vld [vmem:[#allocation16 + $0x2d4] ss:$8 sps:$4 sm:$0xff]  }
 0x563   : > { %1708 = vmatmul.mubr.f32.vlgmr.msra.gmra.mrb[2].mxu0 %v1636_v31 }
 0x564   : > { %2200 = vmatpush1.bf16.msra.mxu0 %v3451_v26  ;;  %v3546_v26 = vld [vmem:[#allocation16 + $0x204] ss:$8 sps:$4 sm:$0xff]  }
 0x565   : > { %2201 = vmatprep.subr.bf16.mxu0 %v3459_v32  ;;  %2433 = vmatprep.subr.bf16.mxu1 %v3546_v26  ;;  %v3588_v26 = vld [vmem:[#allocation16 + $0x2e4] ss:$8 sps:$4 sm:$0xff]  }
 0x568   : > { %2202 = vmatpush1.bf16.msra.mxu0 %v3457_v37 }
 0x569   : > { %2203 = vmatprep.subr.bf16.mxu0 %v3465_v40 }
 0x56c   : > { %2204 = vmatpush1.bf16.msra.mxu0 %v3463_v47  ;;  %v1534_v47 = vld [vmem:[#allocation13] sm:$0x3] }
 0x56d   : > { %2205 = vmatprep.subr.bf16.mxu0 %v3471_v63  ;;  %v1730_v9 = vrot.slane %v1534_v47, %v4542_v22 }
 0x570   : > { %2206 = vmatpush1.bf16.msra.mxu0 %v3469_v4 }
 0x571   : > { %2207 = vmatprep.subr.bf16.mxu0 %v3477_v18  ;;  %v1734_v18 = vrot.slane %v1534_v47, %v4558_v11 }
 0x574   : > { %2208 = vmatpush1.bf16.msra.mxu0 %v3475_v23  ;;  %v1743_v23 = vrot.slane %v1535_v59, %v4542_v22 }
 0x575   : > { %2209 = vmatprep.subr.bf16.mxu0 %v3483_v39  ;;  %v1747_v39 = vrot.slane %v1535_v59, %v4558_v11 }
 0x578   : > { %2210 = vmatpush1.bf16.msra.mxu0 %v3481_v44 }
 0x579   : > { %2211 = vmatprep.subr.bf16.mxu0 %v3489_v58 }
 0x57c   : > { %2212 = vmatpush1.bf16.msra.mxu0 %v3487_v60 }
 0x57d   : > { %2213 = vmatprep.subr.bf16.mxu0 %v3495_v17 }
 0x580   : > { %2214 = vmatpush1.bf16.msra.mxu0 %v3493_v6 }
 0x581   : > { %2215 = vmatprep.subr.bf16.mxu0 %v3501_v27 }
 0x584   : > { %2216 = vmatpush1.bf16.msra.mxu0 %v3499_v30 }
 0x585   : > { %2217 = vmatprep.subr.bf16.mxu0 %v3507_v38 }
 0x588   : > { %2218 = vmatpush1.bf16.msra.mxu0 %v3505_v42  ;;  %v3547_v42 = vld [vmem:[#allocation16 + $0x210] ss:$8 sps:$4 sm:$0xff]  }
 0x589   : > { %2219 = vmatprep.subr.bf16.mxu0 %v3513_v46  ;;  %v3550_v46 = vld [vmem:[#allocation16 + $0x220] ss:$8 sps:$4 sm:$0xff]  }
 0x58c   : > { %2220 = vmatpush1.bf16.msra.mxu0 %v3511_v50  ;;  %v3553_v50 = vld [vmem:[#allocation16 + $0x230] ss:$8 sps:$4 sm:$0xff]  }
 0x58d   : > { %2221 = vmatprep.subr.bf16.mxu0 %v3519_v54  ;;  %v3556_v54 = vld [vmem:[#allocation16 + $0x240] ss:$8 sps:$4 sm:$0xff]  }
 0x590   : > { %2222 = vmatpush1.bf16.msra.mxu0 %v3517_v15  ;;  %v3559_v15 = vld [vmem:[#allocation16 + $0x250] ss:$8 sps:$4 sm:$0xff]  }
 0x591   : > { %2223 = vmatprep.subr.bf16.mxu0 %v3525_v61  ;;  %v3562_v61 = vld [vmem:[#allocation16 + $0x260] ss:$8 sps:$4 sm:$0xff]  }
 0x594   : > { %2224 = vmatpush1.bf16.msra.mxu0 %v3523_v1  ;;  %v3565_v1 = vld [vmem:[#allocation16 + $0x270] ss:$8 sps:$4 sm:$0xff]  }
 0x595   : > { %2225 = vmatprep.subr.bf16.mxu0 %v3531_v2  ;;  %v3568_v2 = vld [vmem:[#allocation16 + $0x280] ss:$8 sps:$4 sm:$0xff]  }
 0x598   : > { %2226 = vmatpush1.bf16.msra.mxu0 %v3529_v10  ;;  %v3571_v10 = vld [vmem:[#allocation16 + $0x290] ss:$8 sps:$4 sm:$0xff]  }
 0x599   : > { %2227 = vmatprep.subr.bf16.mxu0 %v3537_v7  ;;  %v3574_v7 = vld [vmem:[#allocation16 + $0x2a0] ss:$8 sps:$4 sm:$0xff]  }
 0x59c   : > { %2228 = vmatpush1.bf16.msra.mxu0 %v3535_v13  ;;  %v3577_v13 = vld [vmem:[#allocation16 + $0x2b0] ss:$8 sps:$4 sm:$0xff]  }
 0x59d   : > { %2229 = vmatprep.subr.bf16.mxu0 %v3543_v19  ;;  %v3580_v19 = vld [vmem:[#allocation16 + $0x2c0] ss:$8 sps:$4 sm:$0xff]  }
 0x5a0   : > { %2230 = vmatpush1.bf16.msra.mxu0 %v3541_v25  ;;  %v3583_v25 = vld [vmem:[#allocation16 + $0x2d0] ss:$8 sps:$4 sm:$0xff]  }
 0x636   : > { %v1709_v31 = vpop.f32.mrb[2].mxu0 }
 0x637   : > { %v1710_v32 = vadd.f32 1e-05, %v1709_v31  ;;  %v1711_v37 = vpop.f32.mrb[3].mxu0  ;;  %v3586_v31 = vld [vmem:[#allocation16 + $0x2e0] ss:$8 sps:$4 sm:$0xff]  }
 0x638   : > { %v1712_v40 = vadd.f32 1e-05, %v1711_v37  ;;  %v3589_v37 = vld [vmem:[#allocation16 + $0x2f0] ss:$8 sps:$4 sm:$0xff]  }
 0x639   : > { %3604 = vrsqrt.f32 %v1710_v32  ;;  %v3591_v32 = vld [vmem:[#allocation16 + $0x2f4] ss:$8 sps:$4 sm:$0xff]  }
 0x63a   : > { %3606 = vrsqrt.f32 %v1712_v40 }
 0x643   : > { %v3605_v51 = vpop.eup %3604 }
 0x644   : > { %v3607_v63 = vpop.eup %3606  ;;  %v1719_v4 = vrot.slane %v3605_v51, %v4542_v22 }
 0x645   : > { %v1723_v12 = vrot.slane %v3607_v63, %v4542_v22 }
 0x646   : > { %v1724_v29 = vmul.f32 %v1719_v4, %v4656_v0 }
 0x647   : > { %v1725_v34 = vmul.f32 %v1723_v12, %v4658_v33 }
 0x648   : > { %v1737_v44 = vmul.f32 %v1730_v9, %v1724_v29 }
 0x649   : > { %v1738_v49 = vmul.f32 %v1734_v18, %v1725_v34 }
 0x64a   : > { %v1750_v53 = vadd.f32 %v1743_v23, %v1737_v44 }
 0x64b   : > { %v1751_v58 = vadd.f32 %v1747_v39, %v1738_v49  ;;  %v1768_v49 = vld [vmem:[#allocation17] sm:$0x3] }
 0x64c   : > { %v2800_v60 = vmul.f32 -1.442695, %v1750_v53 }
 0x64d   : > { %v2801_v62 = vmul.f32 -1.442695, %v1751_v58 }
 0x64e   : > { %3608 = vpow2.f32 %v2800_v60 }
 0x64f   : > { %3610 = vpow2.f32 %v2801_v62  ;;  %v2484_v62 = vrot.slane %v1768_v49, %v4542_v22  ;;  %v3616_v22 = vld [vmem:[%s4375_s28] sm:$0xff] }
 0x658   : > { %v3609_v21 = vpop.eup %3608 }
 0x659   : > { %v3611_v6 = vpop.eup %3610  ;;  %v1758_v17 = vadd.f32 1.0, %v3609_v21 }
 0x65a   : > { %v1759_v24 = vadd.f32 1.0, %v3611_v6 }
 0x65b   : > { %3612 = vrcp.f32 %v1758_v17 }
 0x65c   : > { %3614 = vrcp.f32 %v1759_v24  ;;  %v2488_v24 = vrot.slane %v1768_v49, %v4558_v11 }
 0x665   : > { %v3613_v27 = vpop.eup %3612 }
 0x666   : > { %v3615_v0 = vpop.eup %3614  ;;  %v1764_v28 = vmul.f32 %v3613_v27, %v1750_v53 }
 0x667   : > { %v1765_v33 = vmul.f32 %v3615_v0, %v1751_v58 }
 0x668   : > { %v4672_v38 = vpack.c.bf16 %v1764_v28, %v1764_v28 }
 0x669   : > { %v1767_v30 = vpack.c.bf16 %v1765_v33, %v1765_v33 }
 0x66b   : > { %2026 = vmatprep.mubr.bf16.mxu1 %v1767_v30  ;;  %2231 = vmatprep.mubr.bf16.mxu0 %v1767_v30 }
 0x66c   : > { %2027 = vmatmul.mubr.bf16.vlgmr.msra.gmra.mrb[8].mxu1 %v4672_v38  ;;  %2232 = vmatmul.mubr.bf16.vlgmr.msra.gmra.mrb[12].mxu0 %v4672_v38 }
 0x66d   : > { %2434 = vmatpush1.bf16.msra.mxu1 %v3544_v36  ;;  %2465 = vmatprep.mubr.bf16.mxu1 %v1767_v30 }
 0x66e   : > { %2435 = vmatprep.subr.bf16.mxu1 %v3549_v41 }
 0x671   : > { %2436 = vmatpush1.bf16.msra.mxu1 %v3547_v42 }
 0x672   : > { %2437 = vmatprep.subr.bf16.mxu1 %v3552_v45 }
 0x675   : > { %2438 = vmatpush1.bf16.msra.mxu1 %v3550_v46 }
 0x676   : > { %2439 = vmatprep.subr.bf16.mxu1 %v3555_v48 }
 0x679   : > { %2440 = vmatpush1.bf16.msra.mxu1 %v3553_v50 }
 0x67a   : > { %2441 = vmatprep.subr.bf16.mxu1 %v3558_v52 }
 0x67d   : > { %2442 = vmatpush1.bf16.msra.mxu1 %v3556_v54 }
 0x67e   : > { %2443 = vmatprep.subr.bf16.mxu1 %v3561_v56 }
 0x681   : > { %2444 = vmatpush1.bf16.msra.mxu1 %v3559_v15 }
 0x682   : > { %2445 = vmatprep.subr.bf16.mxu1 %v3564_v57 }
 0x685   : > { %2446 = vmatpush1.bf16.msra.mxu1 %v3562_v61 }
 0x686   : > { %2447 = vmatprep.subr.bf16.mxu1 %v3567_v43 }
 0x689   : > { %2448 = vmatpush1.bf16.msra.mxu1 %v3565_v1 }
 0x68a   : > { %2449 = vmatprep.subr.bf16.mxu1 %v3570_v35 }
 0x68d   : > { %2450 = vmatpush1.bf16.msra.mxu1 %v3568_v2 }
 0x68e   : > { %2451 = vmatprep.subr.bf16.mxu1 %v3573_v5 }
 0x691   : > { %2452 = vmatpush1.bf16.msra.mxu1 %v3571_v10 }
 0x692   : > { %2453 = vmatprep.subr.bf16.mxu1 %v3576_v16 }
 0x695   : > { %2454 = vmatpush1.bf16.msra.mxu1 %v3574_v7 }
 0x696   : > { %2455 = vmatprep.subr.bf16.mxu1 %v3579_v8 }
 0x699   : > { %2456 = vmatpush1.bf16.msra.mxu1 %v3577_v13 }
 0x69a   : > { %2457 = vmatprep.subr.bf16.mxu1 %v3582_v14 }
 0x69d   : > { %2458 = vmatpush1.bf16.msra.mxu1 %v3580_v19 }
 0x69e   : > { %2459 = vmatprep.subr.bf16.mxu1 %v3585_v20 }
 0x6a1   : > { %2460 = vmatpush1.bf16.msra.mxu1 %v3583_v25 }
 0x6a2   : > { %2461 = vmatprep.subr.bf16.mxu1 %v3588_v26 }
 0x6a5   : > { %2462 = vmatpush1.bf16.msra.mxu1 %v3586_v31 }
 0x6a6   : > { %2463 = vmatprep.subr.bf16.mxu1 %v3591_v32 }
 0x6a9   : > { %2464 = vmatpush1.bf16.msra.mxu1 %v3589_v37 }
 0x6ac   : > { %2466 = vmatmul.mubr.bf16.vlgmr.msra.gmra.mrb[12].mxu1 %v4672_v38  ;;  %v3617_v38 = vld [vmem:[%s4375_s28 + $0x8] sm:$0xff]  ;;  %s3904_s28 = sshll.u32 %s4002_s19, 4  ;;  %s3905_s28 = int_to_ptr.vmem [resolvable:$false] %s3904_s28 }
 0x6ad   : > { %s3906_s27 = scalar_lea.vmem %s3905_s28, 256  ;;  %p3907_p6 = scmp.lt.s32.totalorder %s4696_s11, %s3905_s28 }
 0x6ae   : > { %p3908_p10 = scmp.lt.s32.totalorder %s3906_s27, %s3900_s10 }
 0x6b0   : > { %p3909_p11 = por %p3908_p10, %p3907_p6 }
 0x6b2   : > { %p3910_p8 = pnand %p3909_p11, %p3903_p0 }
 0x73f   : > { %v2028_v40 = vpop.f32.mrb[8].mxu1  ;;  %v2233_v47 = vpop.f32.mrb[12].mxu0 }
 0x740   : > { %v2035_v51 = vrot.slane %v2028_v40, 7  ;;  %v2030_v59 = vpop.f32.mrb[9].mxu1  ;;  %v2235_v63 = vpop.f32.mrb[13].mxu0 }
 0x741   : > { %v2036_v4 = vrot.slane %v2030_v59, 7  ;;  %v2032_v9 = vpop.f32.mrb[10].mxu1  ;;  %v2237_v12 = vpop.f32.mrb[14].mxu0 }
 0x742   : > { %v2037_v18 = vsel %vm1067_vm0, %v2035_v51, 0.0  ;;  %v2033_v23 = vpop.f32.mrb[11].mxu1  ;;  %v2238_v29 = vpop.f32.mrb[15].mxu0 }
 0x743   : > { %v2234_v34 = vadd.f32 %v2233_v47, %v2037_v18  ;;  %v2038_v39 = vsel %vm1067_vm0, %v2036_v4, 0.0 }
 0x744   : > { %v2236_v44 = vadd.f32 %v2235_v63, %v2038_v39 }
 0x77f   : > { %v2467_v53 = vpop.f32.mrb[12].mxu1 }
 0x780   : > { %v2474_v58 = vrot.slane %v2467_v53, 1  ;;  %v2469_v60 = vpop.f32.mrb[13].mxu1 }
 0x781   : > { %v2475_v21 = vrot.slane %v2469_v60, 1  ;;  %v2471_v6 = vpop.f32.mrb[14].mxu1 }
 0x782   : > { %v2476_v17 = vsel %vm1513_vm1, %v2474_v58, 0.0  ;;  %v2472_v3 = vpop.f32.mrb[15].mxu1 }
 0x783   : > { %v2478_v27 = vadd.f32 %v2476_v17, %v2234_v34  ;;  %v2477_v0 = vsel %vm1513_vm1, %v2475_v21, 0.0 }
 0x784   : > { %v2479_v28 = vadd.f32 %v2477_v0, %v2236_v44 }
 0x785   : > { %v2491_v33 = vadd.f32 %v2484_v62, %v2478_v27 }
 0x786   : > { %v2492_v30 = vadd.f32 %v2488_v24, %v2479_v28 }
 0x787   : > { %v2493_v36 = vadd.f32 %v3616_v22, %v2491_v33 }
 0x788   : > { %v2494_v41 = vadd.f32 %v3617_v38, %v2492_v30 }
 0x78a   : > { %v2905_v42 = vpack.c.bf16 %v2494_v41, %v2493_v36 }
 0x78c   : > { %2503 = vst [vmem:[%s494_s20] sm:$0xff] %v2905_v42 }
 0x78d   : > { %3913 = shalt.err (!%p3910_p8)
}
 0x78e   : > { %s3914_s17 = scalar_lea.hbm %s4694_s25, 128  ;;  %s3918_s22 = scalar_lea.hbm %s4776_s21, 256 }
 0x78f   : > { %p3915_p5 = scmp.ne.s32.totalorder %s4694_s25, %s3914_s17  ;;  %p3919_p4 = scmp.lt.u32.totalorder %s4694_s25, %s4776_s21 }
 0x790   : > { %p3920_p12 = scmp.lt.u32.totalorder %s3918_s22, %s3914_s17  ;;  %p3922_p1 = scmp.lt.u32.totalorder %s3914_s17, %s4694_s25 }
 0x791   : > { %p3916_p9 = pnand %p3915_p5, %p4777_p3 }
 0x792   : > { %p3921_p13 = por %p3920_p12, %p3919_p4 }
 0x793   : > { %p3917_p7 = pneg %p3916_p9 }
 0x794   : > { %p3923_p2 = por %p3922_p1, %p3921_p13 }
 0x796   : > { %p3924_p0 = pnand %p3923_p2, %p3917_p7 }
 0x798   : > { %3927 = shalt.err (!%p3924_p0)
}
 0x799   : > { %3201 = dma.vmem_to_hbm [thread:$0]  (%p4777_p3), %s4696_s11, 128, %s4694_s25, %s2505_s12  }
 0x79a PF: > { %s2531_s10 = sand.u32 1, %s3974_s13   ;;  %p4778_p6 = scmp.ne.s32.totalorder %s4762_s29, 0 }
 0x79b   : > { %p4779_p10 = scmp.ge.s32.totalorder %s3986_s16, 2  ;;  %s2532_s28 = scalar_lea.sflag [#allocation4], %s2531_s10 }
 0x79d   : > { %p3236_p11 = pnand %p4779_p10, %p4778_p6 }
 0x79f   : > { %3969 = dma.done.wait (!%p3236_p11), %s2532_s28, 128  }
 0x7a0   : > { %3971 = vsyncadd (!%p3236_p11), %s2532_s28, 4294967168  ;;  %p28_p8 = scmp.ge.s32.totalorder %s4301_s23, 4   ;;  %s4780_s13 = smov %s3978_s14 }
 0x7a1   : > { %s4781_s14 = smov %s3982_s15  ;;  %s4782_s15 = smov %s4313_s18 }
 0x7a2   : > { %s4783_s16 = smov %s4301_s23  ;;  %30 = sbr.rel (!%p28_p8) target bundleno = 12 (0xc), region = 145 }
 0x7a9   :  { %2537 = vsyncpa [#allocation3], 1 }
 0x7aa   :  { %2539 = vsyncpa [#allocation3 + $0x1], 1 }
 0x7ab   :  { %2540 = vsyncpa [#allocation6], 1 }
 0x7ac   :  { %2541 = vsyncpa [#allocation9], 1 }
 0x7ad   :  { %2542 = vsyncpa [#allocation12], 1 }
 0x7ae   :  { %2543 = vsyncpa [#allocation15], 1 }
 0x7af   :  { %2544 = vsyncpa [#allocation18], 1 }
 0x7b0   :  { %2545 = vsyncpa [#allocation4], 1 }
 0x7b1   :  { %2547 = vsyncpa [#allocation4 + $0x1], 1 }

</bundles_post_ra>
